<compile_context>
chip_gen: v7x
topology: tpu7x:2x2x1
jax: 0.10.0
libtpu: 0.0.40
codegen_flags: <defaults>
</compile_context>

<pallas_src>
import functools

import jax
import jax.numpy as jnp
from jax.experimental import pallas as pl
from jax.experimental.pallas import tpu as pltpu

# ---- model hyper-parameters (mirror the module's __init__ arguments) --------
EMBED_DIM = 128         # embedding_dimension
HIDDEN = 64             # lstm_hidden_dimension
NUM_CLASSES = 8         # number_of_classes
NUM_LSTM_LAYERS = 1     # num_lstm_layers (ht[-1] == final hidden of the only layer)
MLP_HIDDEN = 32         # mlp_hidden_layer_dimension (linear2 never used in forward)
BATCH = 2
SEQ = 8


def double_lstm_kernel(title_ref, body_ref,
                       wih_t_ref, wih_b_ref, whh_ref, b_ref,
                       wlin_ref, blin_ref,
                       out_ref, xg_ref, *, B, T, H):
    """Single-grid-point kernel: fused double-LSTM recurrence + linear head.

    Fused gate column layout (8H = 512 lanes):
        [ i_title i_body | f_title f_body | o_title o_body | g_title g_body ]
    Fused state layout (2H = 128 lanes): [ h_title | h_body ] (same for c).
    """
    H2, H4, H6, H8 = 2 * H, 4 * H, 6 * H, 8 * H

    # ---- hoisted input projection (once, off the serial chain) -------------
    # title_ref/body_ref: (B*T, E) bf16, batch-major rows (row = b*T + t).
    # The two weights are zero on the other stream's columns, so the sum lands
    # both streams' input gates in the fused 8H layout in one shot.
    xg = (jnp.dot(title_ref[...], wih_t_ref[...], preferred_element_type=jnp.float32)
          + jnp.dot(body_ref[...], wih_b_ref[...], preferred_element_type=jnp.float32)
          + b_ref[...])                                     # (B*T, 8H) f32
    xg_ref[...] = xg.reshape(B, T, H8)                      # layout-trivial major split

    whh = whh_ref[...]                                      # (2H, 8H) bf16, block-structured

    h = jnp.zeros((B, H2), jnp.float32)
    c = jnp.zeros((B, H2), jnp.float32)

    # ---- fused recurrence, fully unrolled (T static & small) ---------------
    for t in range(T):
        gates = xg_ref[:, t, :] + jnp.dot(h.astype(whh.dtype), whh,
                                          preferred_element_type=jnp.float32)  # (B, 8H)
        ifo = jax.nn.sigmoid(gates[:, :H6])                 # i|f|o : one 384-lane sigmoid
        g = jnp.tanh(gates[:, H6:])                         # g     : one 128-lane tanh
        c = ifo[:, H2:H4] * c + ifo[:, :H2] * g             # f*c + i*g   (both streams)
        h = ifo[:, H4:] * jnp.tanh(c)                       # o*tanh(c)

    # h == [h_title | h_body] -> torch.cat is free; nn.Dropout is identity in eval.
    out_ref[...] = (jnp.dot(h, wlin_ref[...], preferred_element_type=jnp.float32)
                    + blin_ref[...])                        # (B, C)


def double_lstm_forward(input_tsr, params):
    """input_tsr: (2, B, T, E) float32 — [0] title embeddings, [1] body embeddings."""
    _, B, T, E = input_tsr.shape
    H = HIDDEN
    C = params["blin"].shape[-1]

    # Layout-free reshape only — no time-major transpose needed anymore.
    x = input_tsr.astype(jnp.bfloat16).reshape(2, B * T, E)
    title_flat, body_flat = x[0], x[1]

    args = (title_flat, body_flat,
            params["wih_t_f"], params["wih_b_f"], params["whh_f"], params["b_f"],
            params["wlin"], params["blin"])

    def full_spec(a):
        # One block == whole array (everything fits comfortably in VMEM).
        return pl.BlockSpec(a.shape, lambda i, _nd=a.ndim: (0,) * _nd)

    kernel = functools.partial(double_lstm_kernel, B=B, T=T, H=H)

    return pl.pallas_call(
        kernel,
        out_shape=jax.ShapeDtypeStruct((B, C), jnp.float32),
        grid=(1,),
        in_specs=[full_spec(a) for a in args],
        out_specs=pl.BlockSpec((B, C), lambda i: (0, 0)),
        scratch_shapes=[pltpu.VMEM((B, T, 8 * H), jnp.float32)],   # precomputed gates
        compiler_params=pltpu.CompilerParams(dimension_semantics=("arbitrary",)),
    )(*args)


def init_params(key):
    """Deterministic init matching PyTorch shapes, then packed for the kernel.

    PyTorch stores weight_ih_l0 as (4H, E) / weight_hh_l0 as (4H, H) with gate
    order (i, f, g, o); here they are generated pre-transposed to (E, 4H) /
    (H, 4H), biases folded (bias_ih + bias_hh), then scattered into the fused
    column layout [i_t i_b | f_t f_b | o_t o_b | g_t g_b] used by the kernel.
    linear1 weight (C, 2H) is pre-transposed to (2H, C).
    """
    H, E, C = HIDDEN, EMBED_DIM, NUM_CLASSES
    ks = jax.random.split(key, 10)
    s_lstm = 1.0 / float(jnp.sqrt(H))
    s_lin = 1.0 / float(jnp.sqrt(2 * H))

    def u(k, shape, s):
        return jax.random.uniform(k, shape, jnp.float32, -s, s)

    wih_t = u(ks[0], (E, 4 * H), s_lstm)
    whh_t = u(ks[1], (H, 4 * H), s_lstm)
    b_t = u(ks[2], (1, 4 * H), s_lstm) + u(ks[3], (1, 4 * H), s_lstm)   # bias_ih + bias_hh
    wih_b = u(ks[4], (E, 4 * H), s_lstm)
    whh_b = u(ks[5], (H, 4 * H), s_lstm)
    b_b = u(ks[6], (1, 4 * H), s_lstm) + u(ks[7], (1, 4 * H), s_lstm)
    wlin = u(ks[8], (2 * H, C), s_lin)
    blin = u(ks[9], (1, C), s_lin)

    def pack_cols(w, stream):
        """Scatter one stream's (i,f,g,o)-ordered gate columns into the fused
        8H layout; the other stream's columns stay zero."""
        rows = w.shape[0]
        out = jnp.zeros((rows, 8 * H), w.dtype)
        off = 0 if stream == "title" else H
        chunks = {"i": w[:, 0:H], "f": w[:, H:2 * H],
                  "g": w[:, 2 * H:3 * H], "o": w[:, 3 * H:4 * H]}
        for slot, name in enumerate(("i", "f", "o", "g")):
            base = slot * 2 * H + off
            out = out.at[:, base:base + H].set(chunks[name])
        return out

    # Block-structured fused W_hh: rows [0:H] (h_title) feed only title gate
    # columns, rows [H:2H] (h_body) feed only body gate columns.
    whh_f = jnp.concatenate([pack_cols(whh_t, "title"),
                             pack_cols(whh_b, "body")], axis=0)        # (2H, 8H)

    # TODO(synk): linear2 (MLP_HIDDEN -> C) is constructed in __init__ but never
    # used in forward, so it is not materialized here.
    return {
        "wih_t_f": pack_cols(wih_t, "title").astype(jnp.bfloat16),     # (E, 8H)
        "wih_b_f": pack_cols(wih_b, "body").astype(jnp.bfloat16),      # (E, 8H)
        "whh_f":   whh_f.astype(jnp.bfloat16),                         # (2H, 8H)
        "b_f":     pack_cols(b_t, "title") + pack_cols(b_b, "body"),   # (1, 8H) f32
        "wlin":    wlin,                                               # (2H, C) f32
        "blin":    blin,                                               # (1, C) f32
    }


if __name__ == "__main__":
    key = jax.random.PRNGKey(0)
    kp, kx = jax.random.split(key)
    params = init_params(kp)

    # inputTsr: (2, B, T, E) — [0] = title embeddings, [1] = body embeddings
    input_tsr = jax.random.normal(kx, (2, BATCH, SEQ, EMBED_DIM), jnp.float32)

    out = jax.jit(double_lstm_forward)(input_tsr, params)
    out = jax.block_until_ready(out)
    assert out.shape == (BATCH, NUM_CLASSES)
    assert bool(jnp.all(jnp.isfinite(out)))
    print("KERNEL_OK")
</pallas_src>

<mosaic_0001>
module attributes {stable_mosaic.version = 11 : i64} {
  func.func @double_lstm_kernel(%arg0: i32, %arg1: memref<16x128xbf16, #tpu.memory_space<vmem>>, %arg2: memref<16x128xbf16, #tpu.memory_space<vmem>>, %arg3: memref<128x512xbf16, #tpu.memory_space<vmem>>, %arg4: memref<128x512xbf16, #tpu.memory_space<vmem>>, %arg5: memref<128x512xbf16, #tpu.memory_space<vmem>>, %arg6: memref<1x512xf32, #tpu.memory_space<vmem>>, %arg7: memref<128x8xf32, #tpu.memory_space<vmem>>, %arg8: memref<1x8xf32, #tpu.memory_space<vmem>>, %arg9: memref<2x8xf32, #tpu.memory_space<vmem>>, %arg10: memref<2x8x512xf32, #tpu.memory_space<vmem>>) attributes {dimension_semantics = [#tpu.dimension_semantics<arbitrary>], iteration_bounds = array<i64: 1>, scalar_prefetch = 0 : i64, scratch_operands = 1 : i64, tpu.core_type = #tpu.core_type<tc>, window_params = [{pipeline_mode = #tpu.pipeline_mode<synchronous>, transform_indices = @transform_0, window_bounds = array<i64: 16, 128>}, {pipeline_mode = #tpu.pipeline_mode<synchronous>, transform_indices = @transform_1, window_bounds = array<i64: 16, 128>}, {pipeline_mode = #tpu.pipeline_mode<synchronous>, transform_indices = @transform_2, window_bounds = array<i64: 128, 512>}, {pipeline_mode = #tpu.pipeline_mode<synchronous>, transform_indices = @transform_3, window_bounds = array<i64: 128, 512>}, {pipeline_mode = #tpu.pipeline_mode<synchronous>, transform_indices = @transform_4, window_bounds = array<i64: 128, 512>}, {pipeline_mode = #tpu.pipeline_mode<synchronous>, transform_indices = @transform_5, window_bounds = array<i64: 1, 512>}, {pipeline_mode = #tpu.pipeline_mode<synchronous>, transform_indices = @transform_6, window_bounds = array<i64: 128, 8>}, {pipeline_mode = #tpu.pipeline_mode<synchronous>, transform_indices = @transform_7, window_bounds = array<i64: 1, 8>}, {pipeline_mode = #tpu.pipeline_mode<synchronous>, transform_indices = @transform_8, window_bounds = array<i64: 2, 8>}]} {
    %c0 = arith.constant 0 : index
    %c0_0 = arith.constant 0 : index
    %0 = vector.load %arg1[%c0, %c0_0] : memref<16x128xbf16, #tpu.memory_space<vmem>>, vector<16x128xbf16>
    %c0_1 = arith.constant 0 : index
    %c0_2 = arith.constant 0 : index
    %1 = vector.load %arg3[%c0_1, %c0_2] : memref<128x512xbf16, #tpu.memory_space<vmem>>, vector<128x512xbf16>
    %cst = arith.constant dense<0.000000e+00> : vector<16x512xf32>
    %2 = tpu.matmul %0, %1, %cst {dimension_numbers = #tpu.dot_dimension_numbers<[1], [0], [0], [1], [0, 0, 1, 1], [], []>} : vector<16x128xbf16>, vector<128x512xbf16>, vector<16x512xf32> -> vector<16x512xf32>
    %c0_3 = arith.constant 0 : index
    %c0_4 = arith.constant 0 : index
    %3 = vector.load %arg2[%c0_3, %c0_4] : memref<16x128xbf16, #tpu.memory_space<vmem>>, vector<16x128xbf16>
    %c0_5 = arith.constant 0 : index
    %c0_6 = arith.constant 0 : index
    %4 = vector.load %arg4[%c0_5, %c0_6] : memref<128x512xbf16, #tpu.memory_space<vmem>>, vector<128x512xbf16>
    %cst_7 = arith.constant dense<0.000000e+00> : vector<16x512xf32>
    %5 = tpu.matmul %3, %4, %cst_7 {dimension_numbers = #tpu.dot_dimension_numbers<[1], [0], [0], [1], [0, 0, 1, 1], [], []>} : vector<16x128xbf16>, vector<128x512xbf16>, vector<16x512xf32> -> vector<16x512xf32>
    %6 = arith.addf %2, %5 : vector<16x512xf32>
    %c0_8 = arith.constant 0 : index
    %c0_9 = arith.constant 0 : index
    %7 = vector.load %arg6[%c0_8, %c0_9] : memref<1x512xf32, #tpu.memory_space<vmem>>, vector<1x512xf32>
    %8 = vector.broadcast %7 : vector<1x512xf32> to vector<16x512xf32>
    %9 = arith.addf %6, %8 : vector<16x512xf32>
    %10 = vector.shape_cast %9 : vector<16x512xf32> to vector<2x8x512xf32>
    %c0_10 = arith.constant 0 : index
    %c0_11 = arith.constant 0 : index
    %c0_12 = arith.constant 0 : index
    %11 = vector.load %arg10[%c0_10, %c0_11, %c0_12] : memref<2x8x512xf32, #tpu.memory_space<vmem>>, vector<2x8x512xf32>
    tpu.vector_store %arg10[%c0_10, %c0_11, %c0_12], %10 {strides = array<i32>} : memref<2x8x512xf32, #tpu.memory_space<vmem>>, vector<2x8x512xf32>,
    %c0_13 = arith.constant 0 : index
    %c0_14 = arith.constant 0 : index
    %12 = vector.load %arg5[%c0_13, %c0_14] : memref<128x512xbf16, #tpu.memory_space<vmem>>, vector<128x512xbf16>
    %cst_15 = arith.constant 0.000000e+00 : f32
    %13 = vector.broadcast %cst_15 : f32 to vector<2x128xf32>
    %cst_16 = arith.constant 0.000000e+00 : f32
    %14 = vector.broadcast %cst_16 : f32 to vector<2x128xf32>
    %c0_17 = arith.constant 0 : index
    %c0_18 = arith.constant 0 : index
    %c0_19 = arith.constant 0 : index
    %15 = vector.load %arg10[%c0_17, %c0_18, %c0_19] : memref<2x8x512xf32, #tpu.memory_space<vmem>>, vector<2x1x512xf32>
    %16 = vector.shape_cast %15 : vector<2x1x512xf32> to vector<2x512xf32>
    %17 = arith.truncf %13 : vector<2x128xf32> to vector<2x128xbf16>
    %cst_20 = arith.constant dense<0.000000e+00> : vector<2x512xf32>
    %18 = tpu.matmul %17, %12, %cst_20 {dimension_numbers = #tpu.dot_dimension_numbers<[1], [0], [0], [1], [0, 0, 1, 1], [], []>} : vector<2x128xbf16>, vector<128x512xbf16>, vector<2x512xf32> -> vector<2x512xf32>
    %19 = arith.addf %16, %18 : vector<2x512xf32>
    %20 = vector.extract_strided_slice %19 {offsets = [0, 0], sizes = [2, 384], strides = [1, 1]} : vector<2x512xf32> to vector<2x384xf32>
    %21 = arith.negf %20 : vector<2x384xf32>
    %22 = math.exp %21 : vector<2x384xf32>
    %cst_21 = arith.constant 1.000000e+00 : f32
    %23 = vector.broadcast %cst_21 : f32 to vector<2x384xf32>
    %24 = arith.addf %23, %22 : vector<2x384xf32>
    %25 = arith.divf %23, %24 : vector<2x384xf32>
    %26 = vector.extract_strided_slice %19 {offsets = [0, 384], sizes = [2, 128], strides = [1, 1]} : vector<2x512xf32> to vector<2x128xf32>
    %27 = math.tanh %26 : vector<2x128xf32>
    %28 = vector.extract_strided_slice %25 {offsets = [0, 128], sizes = [2, 128], strides = [1, 1]} : vector<2x384xf32> to vector<2x128xf32>
    %29 = arith.mulf %28, %14 : vector<2x128xf32>
    %30 = vector.extract_strided_slice %25 {offsets = [0, 0], sizes = [2, 128], strides = [1, 1]} : vector<2x384xf32> to vector<2x128xf32>
    %31 = arith.mulf %30, %27 : vector<2x128xf32>
    %32 = arith.addf %29, %31 : vector<2x128xf32>
    %33 = vector.extract_strided_slice %25 {offsets = [0, 256], sizes = [2, 128], strides = [1, 1]} : vector<2x384xf32> to vector<2x128xf32>
    %34 = math.tanh %32 : vector<2x128xf32>
    %35 = arith.mulf %33, %34 : vector<2x128xf32>
    %c0_22 = arith.constant 0 : index
    %c1 = arith.constant 1 : index
    %c0_23 = arith.constant 0 : index
    %36 = vector.load %arg10[%c0_22, %c1, %c0_23] : memref<2x8x512xf32, #tpu.memory_space<vmem>>, vector<2x1x512xf32>
    %37 = vector.shape_cast %36 : vector<2x1x512xf32> to vector<2x512xf32>
    %38 = arith.truncf %35 : vector<2x128xf32> to vector<2x128xbf16>
    %cst_24 = arith.constant dense<0.000000e+00> : vector<2x512xf32>
    %39 = tpu.matmul %38, %12, %cst_24 {dimension_numbers = #tpu.dot_dimension_numbers<[1], [0], [0], [1], [0, 0, 1, 1], [], []>} : vector<2x128xbf16>, vector<128x512xbf16>, vector<2x512xf32> -> vector<2x512xf32>
    %40 = arith.addf %37, %39 : vector<2x512xf32>
    %41 = vector.extract_strided_slice %40 {offsets = [0, 0], sizes = [2, 384], strides = [1, 1]} : vector<2x512xf32> to vector<2x384xf32>
    %42 = arith.negf %41 : vector<2x384xf32>
    %43 = math.exp %42 : vector<2x384xf32>
    %cst_25 = arith.constant 1.000000e+00 : f32
    %44 = vector.broadcast %cst_25 : f32 to vector<2x384xf32>
    %45 = arith.addf %44, %43 : vector<2x384xf32>
    %46 = arith.divf %44, %45 : vector<2x384xf32>
    %47 = vector.extract_strided_slice %40 {offsets = [0, 384], sizes = [2, 128], strides = [1, 1]} : vector<2x512xf32> to vector<2x128xf32>
    %48 = math.tanh %47 : vector<2x128xf32>
    %49 = vector.extract_strided_slice %46 {offsets = [0, 128], sizes = [2, 128], strides = [1, 1]} : vector<2x384xf32> to vector<2x128xf32>
    %50 = arith.mulf %49, %32 : vector<2x128xf32>
    %51 = vector.extract_strided_slice %46 {offsets = [0, 0], sizes = [2, 128], strides = [1, 1]} : vector<2x384xf32> to vector<2x128xf32>
    %52 = arith.mulf %51, %48 : vector<2x128xf32>
    %53 = arith.addf %50, %52 : vector<2x128xf32>
    %54 = vector.extract_strided_slice %46 {offsets = [0, 256], sizes = [2, 128], strides = [1, 1]} : vector<2x384xf32> to vector<2x128xf32>
    %55 = math.tanh %53 : vector<2x128xf32>
    %56 = arith.mulf %54, %55 : vector<2x128xf32>
    %c0_26 = arith.constant 0 : index
    %c2 = arith.constant 2 : index
    %c0_27 = arith.constant 0 : index
    %57 = vector.load %arg10[%c0_26, %c2, %c0_27] : memref<2x8x512xf32, #tpu.memory_space<vmem>>, vector<2x1x512xf32>
    %58 = vector.shape_cast %57 : vector<2x1x512xf32> to vector<2x512xf32>
    %59 = arith.truncf %56 : vector<2x128xf32> to vector<2x128xbf16>
    %cst_28 = arith.constant dense<0.000000e+00> : vector<2x512xf32>
    %60 = tpu.matmul %59, %12, %cst_28 {dimension_numbers = #tpu.dot_dimension_numbers<[1], [0], [0], [1], [0, 0, 1, 1], [], []>} : vector<2x128xbf16>, vector<128x512xbf16>, vector<2x512xf32> -> vector<2x512xf32>
    %61 = arith.addf %58, %60 : vector<2x512xf32>
    %62 = vector.extract_strided_slice %61 {offsets = [0, 0], sizes = [2, 384], strides = [1, 1]} : vector<2x512xf32> to vector<2x384xf32>
    %63 = arith.negf %62 : vector<2x384xf32>
    %64 = math.exp %63 : vector<2x384xf32>
    %cst_29 = arith.constant 1.000000e+00 : f32
    %65 = vector.broadcast %cst_29 : f32 to vector<2x384xf32>
    %66 = arith.addf %65, %64 : vector<2x384xf32>
    %67 = arith.divf %65, %66 : vector<2x384xf32>
    %68 = vector.extract_strided_slice %61 {offsets = [0, 384], sizes = [2, 128], strides = [1, 1]} : vector<2x512xf32> to vector<2x128xf32>
    %69 = math.tanh %68 : vector<2x128xf32>
    %70 = vector.extract_strided_slice %67 {offsets = [0, 128], sizes = [2, 128], strides = [1, 1]} : vector<2x384xf32> to vector<2x128xf32>
    %71 = arith.mulf %70, %53 : vector<2x128xf32>
    %72 = vector.extract_strided_slice %67 {offsets = [0, 0], sizes = [2, 128], strides = [1, 1]} : vector<2x384xf32> to vector<2x128xf32>
    %73 = arith.mulf %72, %69 : vector<2x128xf32>
    %74 = arith.addf %71, %73 : vector<2x128xf32>
    %75 = vector.extract_strided_slice %67 {offsets = [0, 256], sizes = [2, 128], strides = [1, 1]} : vector<2x384xf32> to vector<2x128xf32>
    %76 = math.tanh %74 : vector<2x128xf32>
    %77 = arith.mulf %75, %76 : vector<2x128xf32>
    %c0_30 = arith.constant 0 : index
    %c3 = arith.constant 3 : index
    %c0_31 = arith.constant 0 : index
    %78 = vector.load %arg10[%c0_30, %c3, %c0_31] : memref<2x8x512xf32, #tpu.memory_space<vmem>>, vector<2x1x512xf32>
    %79 = vector.shape_cast %78 : vector<2x1x512xf32> to vector<2x512xf32>
    %80 = arith.truncf %77 : vector<2x128xf32> to vector<2x128xbf16>
    %cst_32 = arith.constant dense<0.000000e+00> : vector<2x512xf32>
    %81 = tpu.matmul %80, %12, %cst_32 {dimension_numbers = #tpu.dot_dimension_numbers<[1], [0], [0], [1], [0, 0, 1, 1], [], []>} : vector<2x128xbf16>, vector<128x512xbf16>, vector<2x512xf32> -> vector<2x512xf32>
    %82 = arith.addf %79, %81 : vector<2x512xf32>
    %83 = vector.extract_strided_slice %82 {offsets = [0, 0], sizes = [2, 384], strides = [1, 1]} : vector<2x512xf32> to vector<2x384xf32>
    %84 = arith.negf %83 : vector<2x384xf32>
    %85 = math.exp %84 : vector<2x384xf32>
    %cst_33 = arith.constant 1.000000e+00 : f32
    %86 = vector.broadcast %cst_33 : f32 to vector<2x384xf32>
    %87 = arith.addf %86, %85 : vector<2x384xf32>
    %88 = arith.divf %86, %87 : vector<2x384xf32>
    %89 = vector.extract_strided_slice %82 {offsets = [0, 384], sizes = [2, 128], strides = [1, 1]} : vector<2x512xf32> to vector<2x128xf32>
    %90 = math.tanh %89 : vector<2x128xf32>
    %91 = vector.extract_strided_slice %88 {offsets = [0, 128], sizes = [2, 128], strides = [1, 1]} : vector<2x384xf32> to vector<2x128xf32>
    %92 = arith.mulf %91, %74 : vector<2x128xf32>
    %93 = vector.extract_strided_slice %88 {offsets = [0, 0], sizes = [2, 128], strides = [1, 1]} : vector<2x384xf32> to vector<2x128xf32>
    %94 = arith.mulf %93, %90 : vector<2x128xf32>
    %95 = arith.addf %92, %94 : vector<2x128xf32>
    %96 = vector.extract_strided_slice %88 {offsets = [0, 256], sizes = [2, 128], strides = [1, 1]} : vector<2x384xf32> to vector<2x128xf32>
    %97 = math.tanh %95 : vector<2x128xf32>
    %98 = arith.mulf %96, %97 : vector<2x128xf32>
    %c0_34 = arith.constant 0 : index
    %c4 = arith.constant 4 : index
    %c0_35 = arith.constant 0 : index
    %99 = vector.load %arg10[%c0_34, %c4, %c0_35] : memref<2x8x512xf32, #tpu.memory_space<vmem>>, vector<2x1x512xf32>
    %100 = vector.shape_cast %99 : vector<2x1x512xf32> to vector<2x512xf32>
    %101 = arith.truncf %98 : vector<2x128xf32> to vector<2x128xbf16>
    %cst_36 = arith.constant dense<0.000000e+00> : vector<2x512xf32>
    %102 = tpu.matmul %101, %12, %cst_36 {dimension_numbers = #tpu.dot_dimension_numbers<[1], [0], [0], [1], [0, 0, 1, 1], [], []>} : vector<2x128xbf16>, vector<128x512xbf16>, vector<2x512xf32> -> vector<2x512xf32>
    %103 = arith.addf %100, %102 : vector<2x512xf32>
    %104 = vector.extract_strided_slice %103 {offsets = [0, 0], sizes = [2, 384], strides = [1, 1]} : vector<2x512xf32> to vector<2x384xf32>
    %105 = arith.negf %104 : vector<2x384xf32>
    %106 = math.exp %105 : vector<2x384xf32>
    %cst_37 = arith.constant 1.000000e+00 : f32
    %107 = vector.broadcast %cst_37 : f32 to vector<2x384xf32>
    %108 = arith.addf %107, %106 : vector<2x384xf32>
    %109 = arith.divf %107, %108 : vector<2x384xf32>
    %110 = vector.extract_strided_slice %103 {offsets = [0, 384], sizes = [2, 128], strides = [1, 1]} : vector<2x512xf32> to vector<2x128xf32>
    %111 = math.tanh %110 : vector<2x128xf32>
    %112 = vector.extract_strided_slice %109 {offsets = [0, 128], sizes = [2, 128], strides = [1, 1]} : vector<2x384xf32> to vector<2x128xf32>
    %113 = arith.mulf %112, %95 : vector<2x128xf32>
    %114 = vector.extract_strided_slice %109 {offsets = [0, 0], sizes = [2, 128], strides = [1, 1]} : vector<2x384xf32> to vector<2x128xf32>
    %115 = arith.mulf %114, %111 : vector<2x128xf32>
    %116 = arith.addf %113, %115 : vector<2x128xf32>
    %117 = vector.extract_strided_slice %109 {offsets = [0, 256], sizes = [2, 128], strides = [1, 1]} : vector<2x384xf32> to vector<2x128xf32>
    %118 = math.tanh %116 : vector<2x128xf32>
    %119 = arith.mulf %117, %118 : vector<2x128xf32>
    %c0_38 = arith.constant 0 : index
    %c5 = arith.constant 5 : index
    %c0_39 = arith.constant 0 : index
    %120 = vector.load %arg10[%c0_38, %c5, %c0_39] : memref<2x8x512xf32, #tpu.memory_space<vmem>>, vector<2x1x512xf32>
    %121 = vector.shape_cast %120 : vector<2x1x512xf32> to vector<2x512xf32>
    %122 = arith.truncf %119 : vector<2x128xf32> to vector<2x128xbf16>
    %cst_40 = arith.constant dense<0.000000e+00> : vector<2x512xf32>
    %123 = tpu.matmul %122, %12, %cst_40 {dimension_numbers = #tpu.dot_dimension_numbers<[1], [0], [0], [1], [0, 0, 1, 1], [], []>} : vector<2x128xbf16>, vector<128x512xbf16>, vector<2x512xf32> -> vector<2x512xf32>
    %124 = arith.addf %121, %123 : vector<2x512xf32>
    %125 = vector.extract_strided_slice %124 {offsets = [0, 0], sizes = [2, 384], strides = [1, 1]} : vector<2x512xf32> to vector<2x384xf32>
    %126 = arith.negf %125 : vector<2x384xf32>
    %127 = math.exp %126 : vector<2x384xf32>
    %cst_41 = arith.constant 1.000000e+00 : f32
    %128 = vector.broadcast %cst_41 : f32 to vector<2x384xf32>
    %129 = arith.addf %128, %127 : vector<2x384xf32>
    %130 = arith.divf %128, %129 : vector<2x384xf32>
    %131 = vector.extract_strided_slice %124 {offsets = [0, 384], sizes = [2, 128], strides = [1, 1]} : vector<2x512xf32> to vector<2x128xf32>
    %132 = math.tanh %131 : vector<2x128xf32>
    %133 = vector.extract_strided_slice %130 {offsets = [0, 128], sizes = [2, 128], strides = [1, 1]} : vector<2x384xf32> to vector<2x128xf32>
    %134 = arith.mulf %133, %116 : vector<2x128xf32>
    %135 = vector.extract_strided_slice %130 {offsets = [0, 0], sizes = [2, 128], strides = [1, 1]} : vector<2x384xf32> to vector<2x128xf32>
    %136 = arith.mulf %135, %132 : vector<2x128xf32>
    %137 = arith.addf %134, %136 : vector<2x128xf32>
    %138 = vector.extract_strided_slice %130 {offsets = [0, 256], sizes = [2, 128], strides = [1, 1]} : vector<2x384xf32> to vector<2x128xf32>
    %139 = math.tanh %137 : vector<2x128xf32>
    %140 = arith.mulf %138, %139 : vector<2x128xf32>
    %c0_42 = arith.constant 0 : index
    %c6 = arith.constant 6 : index
    %c0_43 = arith.constant 0 : index
    %141 = vector.load %arg10[%c0_42, %c6, %c0_43] : memref<2x8x512xf32, #tpu.memory_space<vmem>>, vector<2x1x512xf32>
    %142 = vector.shape_cast %141 : vector<2x1x512xf32> to vector<2x512xf32>
    %143 = arith.truncf %140 : vector<2x128xf32> to vector<2x128xbf16>
    %cst_44 = arith.constant dense<0.000000e+00> : vector<2x512xf32>
    %144 = tpu.matmul %143, %12, %cst_44 {dimension_numbers = #tpu.dot_dimension_numbers<[1], [0], [0], [1], [0, 0, 1, 1], [], []>} : vector<2x128xbf16>, vector<128x512xbf16>, vector<2x512xf32> -> vector<2x512xf32>
    %145 = arith.addf %142, %144 : vector<2x512xf32>
    %146 = vector.extract_strided_slice %145 {offsets = [0, 0], sizes = [2, 384], strides = [1, 1]} : vector<2x512xf32> to vector<2x384xf32>
    %147 = arith.negf %146 : vector<2x384xf32>
    %148 = math.exp %147 : vector<2x384xf32>
    %cst_45 = arith.constant 1.000000e+00 : f32
    %149 = vector.broadcast %cst_45 : f32 to vector<2x384xf32>
    %150 = arith.addf %149, %148 : vector<2x384xf32>
    %151 = arith.divf %149, %150 : vector<2x384xf32>
    %152 = vector.extract_strided_slice %145 {offsets = [0, 384], sizes = [2, 128], strides = [1, 1]} : vector<2x512xf32> to vector<2x128xf32>
    %153 = math.tanh %152 : vector<2x128xf32>
    %154 = vector.extract_strided_slice %151 {offsets = [0, 128], sizes = [2, 128], strides = [1, 1]} : vector<2x384xf32> to vector<2x128xf32>
    %155 = arith.mulf %154, %137 : vector<2x128xf32>
    %156 = vector.extract_strided_slice %151 {offsets = [0, 0], sizes = [2, 128], strides = [1, 1]} : vector<2x384xf32> to vector<2x128xf32>
    %157 = arith.mulf %156, %153 : vector<2x128xf32>
    %158 = arith.addf %155, %157 : vector<2x128xf32>
    %159 = vector.extract_strided_slice %151 {offsets = [0, 256], sizes = [2, 128], strides = [1, 1]} : vector<2x384xf32> to vector<2x128xf32>
    %160 = math.tanh %158 : vector<2x128xf32>
    %161 = arith.mulf %159, %160 : vector<2x128xf32>
    %c0_46 = arith.constant 0 : index
    %c7 = arith.constant 7 : index
    %c0_47 = arith.constant 0 : index
    %162 = vector.load %arg10[%c0_46, %c7, %c0_47] : memref<2x8x512xf32, #tpu.memory_space<vmem>>, vector<2x1x512xf32>
    %163 = vector.shape_cast %162 : vector<2x1x512xf32> to vector<2x512xf32>
    %164 = arith.truncf %161 : vector<2x128xf32> to vector<2x128xbf16>
    %cst_48 = arith.constant dense<0.000000e+00> : vector<2x512xf32>
    %165 = tpu.matmul %164, %12, %cst_48 {dimension_numbers = #tpu.dot_dimension_numbers<[1], [0], [0], [1], [0, 0, 1, 1], [], []>} : vector<2x128xbf16>, vector<128x512xbf16>, vector<2x512xf32> -> vector<2x512xf32>
    %166 = arith.addf %163, %165 : vector<2x512xf32>
    %167 = vector.extract_strided_slice %166 {offsets = [0, 0], sizes = [2, 384], strides = [1, 1]} : vector<2x512xf32> to vector<2x384xf32>
    %168 = arith.negf %167 : vector<2x384xf32>
    %169 = math.exp %168 : vector<2x384xf32>
    %cst_49 = arith.constant 1.000000e+00 : f32
    %170 = vector.broadcast %cst_49 : f32 to vector<2x384xf32>
    %171 = arith.addf %170, %169 : vector<2x384xf32>
    %172 = arith.divf %170, %171 : vector<2x384xf32>
    %173 = vector.extract_strided_slice %166 {offsets = [0, 384], sizes = [2, 128], strides = [1, 1]} : vector<2x512xf32> to vector<2x128xf32>
    %174 = math.tanh %173 : vector<2x128xf32>
    %175 = vector.extract_strided_slice %172 {offsets = [0, 128], sizes = [2, 128], strides = [1, 1]} : vector<2x384xf32> to vector<2x128xf32>
    %176 = arith.mulf %175, %158 : vector<2x128xf32>
    %177 = vector.extract_strided_slice %172 {offsets = [0, 0], sizes = [2, 128], strides = [1, 1]} : vector<2x384xf32> to vector<2x128xf32>
    %178 = arith.mulf %177, %174 : vector<2x128xf32>
    %179 = arith.addf %176, %178 : vector<2x128xf32>
    %180 = vector.extract_strided_slice %172 {offsets = [0, 256], sizes = [2, 128], strides = [1, 1]} : vector<2x384xf32> to vector<2x128xf32>
    %181 = math.tanh %179 : vector<2x128xf32>
    %182 = arith.mulf %180, %181 : vector<2x128xf32>
    %c0_50 = arith.constant 0 : index
    %c0_51 = arith.constant 0 : index
    %183 = vector.load %arg7[%c0_50, %c0_51] : memref<128x8xf32, #tpu.memory_space<vmem>>, vector<128x8xf32>
    %cst_52 = arith.constant dense<0.000000e+00> : vector<2x8xf32>
    %184 = tpu.matmul %182, %183, %cst_52 {dimension_numbers = #tpu.dot_dimension_numbers<[1], [0], [0], [1], [0, 0, 1, 1], [], []>} : vector<2x128xf32>, vector<128x8xf32>, vector<2x8xf32> -> vector<2x8xf32>
    %c0_53 = arith.constant 0 : index
    %c0_54 = arith.constant 0 : index
    %185 = vector.load %arg8[%c0_53, %c0_54] : memref<1x8xf32, #tpu.memory_space<vmem>>, vector<1x8xf32>
    %186 = vector.broadcast %185 : vector<1x8xf32> to vector<2x8xf32>
    %187 = arith.addf %184, %186 : vector<2x8xf32>
    %c0_55 = arith.constant 0 : index
    %c0_56 = arith.constant 0 : index
    %188 = vector.load %arg9[%c0_55, %c0_56] : memref<2x8xf32, #tpu.memory_space<vmem>>, vector<2x8xf32>
    tpu.vector_store %arg9[%c0_55, %c0_56], %187 {strides = array<i32>} : memref<2x8xf32, #tpu.memory_space<vmem>>, vector<2x8xf32>,
    return
  }
  func.func @transform_0(%arg0: i32) -> (i32, i32) {
    %c0_i32 = arith.constant 0 : i32
    %c0_i32_0 = arith.constant 0 : i32
    %c0_i32_1 = arith.constant 0 : i32
    return %c0_i32, %c0_i32_0 : i32, i32
  }
  func.func @transform_1(%arg0: i32) -> (i32, i32) {
    %c0_i32 = arith.constant 0 : i32
    %c0_i32_0 = arith.constant 0 : i32
    %c0_i32_1 = arith.constant 0 : i32
    return %c0_i32, %c0_i32_0 : i32, i32
  }
  func.func @transform_2(%arg0: i32) -> (i32, i32) {
    %c0_i32 = arith.constant 0 : i32
    %c0_i32_0 = arith.constant 0 : i32
    %c0_i32_1 = arith.constant 0 : i32
    return %c0_i32, %c0_i32_0 : i32, i32
  }
  func.func @transform_3(%arg0: i32) -> (i32, i32) {
    %c0_i32 = arith.constant 0 : i32
    %c0_i32_0 = arith.constant 0 : i32
    %c0_i32_1 = arith.constant 0 : i32
    return %c0_i32, %c0_i32_0 : i32, i32
  }
  func.func @transform_4(%arg0: i32) -> (i32, i32) {
    %c0_i32 = arith.constant 0 : i32
    %c0_i32_0 = arith.constant 0 : i32
    %c0_i32_1 = arith.constant 0 : i32
    return %c0_i32, %c0_i32_0 : i32, i32
  }
  func.func @transform_5(%arg0: i32) -> (i32, i32) {
    %c0_i32 = arith.constant 0 : i32
    %c0_i32_0 = arith.constant 0 : i32
    %c0_i32_1 = arith.constant 0 : i32
    return %c0_i32, %c0_i32_0 : i32, i32
  }
  func.func @transform_6(%arg0: i32) -> (i32, i32) {
    %c0_i32 = arith.constant 0 : i32
    %c0_i32_0 = arith.constant 0 : i32
    %c0_i32_1 = arith.constant 0 : i32
    return %c0_i32, %c0_i32_0 : i32, i32
  }
  func.func @transform_7(%arg0: i32) -> (i32, i32) {
    %c0_i32 = arith.constant 0 : i32
    %c0_i32_0 = arith.constant 0 : i32
    %c0_i32_1 = arith.constant 0 : i32
    return %c0_i32, %c0_i32_0 : i32, i32
  }
  func.func @transform_8(%arg0: i32) -> (i32, i32) {
    %c0_i32 = arith.constant 0 : i32
    %c0_i32_0 = arith.constant 0 : i32
    %c0_i32_1 = arith.constant 0 : i32
    return %c0_i32, %c0_i32_0 : i32, i32
  }
}

</mosaic_0001>

<bundles_post_ra>
// kernel: double_lstm_forward.1
= control target key start
LH: loop header
LB: loop body
LE: loop exit
PB: predicated region body
PF: predicated region fallthrough
CT: control target
= control target key end

     0   :  { %13 = vsyncpa [#allocation4], 0  ;;  %s3727_s0 = inlined_call_operand.vmem [shape: bf16[16,128], index: 0, kind: input, shape index: {}]   ;;  %s3728_s1 = inlined_call_operand.vmem [shape: bf16[16,128], index: 1, kind: input, shape index: {}]   ;;  %s3729_s2 = inlined_call_operand.vmem [shape: bf16[128,512], index: 2, kind: input, shape index: {}]   ;;  %s3730_s3 = inlined_call_operand.hbm [shape: bf16[128,512], index: 3, kind: input, shape index: {}]   ;;  %s3731_s4 = inlined_call_operand.hbm [shape: bf16[128,512], index: 4, kind: input, shape index: {}]   ;;  %s3732_s5 = inlined_call_operand.vmem [shape: f32[1,512], index: 5, kind: input, shape index: {}]   ;;  %s3733_s6 = inlined_call_operand.vmem [shape: f32[128,8], index: 6, kind: input, shape index: {}]   ;;  %s3734_s7 = inlined_call_operand.vmem [shape: f32[1,8], index: 7, kind: input, shape index: {}]   ;;  %s3735_s8 = inlined_call_operand.hbm [shape: f32[2,8], index: 8, kind: output, shape index: {}]  }
   0x1   :  { %14 = vsyncpa [#allocation7], 0 }
   0x2   :  { %15 = vsyncpa [#allocation5], 0  ;;  %s2975_s27 = smov [#allocation3]   ;;  %s2903_s9 = scalar_lea.hbm %s3730_s3, 4096 }
   0x3   :  { %s27_s28 = sshll.u32 %s2975_s27, 4  ;;  %p2904_p0 = scmp.ne.s32.totalorder %s3730_s3, %s2903_s9  ;;  %s28_s28 = int_to_ptr.vmem [resolvable:$true] %s27_s28 }
   0x4   :  { %p2907_p1 = scmp.lt.u32.totalorder %s2903_s9, %s3730_s3 }
   0x6   :  { %p2909_p2 = pnand %p2907_p1, %p2904_p0 }
   0x8   :  { %2912 = shalt.err (!%p2909_p2)
}
   0x9   :  { %s2913_s14 = scalar_lea.vmem %s28_s28, 4096  ;;  %p2918_p4 = scmp.lt.s32.totalorder %s28_s28, %s28_s28 }
   0xa   :  { %p2914_p3 = scmp.ne.s32.totalorder %s28_s28, %s2913_s14  ;;  %p2919_p5 = scmp.lt.s32.totalorder %s2913_s14, %s2913_s14 }
   0xc   :  { %p2920_p6 = por %p2919_p5, %p2918_p4 }
   0xe   :  { %p2921_p7 = pnand %p2920_p6, %p2914_p3 }
  0x10   :  { %2924 = shalt.err (!%p2921_p7)
}
  0x11   :  { %s2976_s15 = smov 256   ;;  %s2977_s16 = smov 16  }
  0x12   :  { %33 = dma.hbm_to_vmem [thread:$0]  %s3730_s3, 4096, %s28_s28, [#allocation4], %s2976_s15, %s2976_s15, %s2977_s16  }
  0x13   :  { %s2978_s19 = smov [#allocation6]   ;;  %s2925_s23 = scalar_lea.hbm %s3731_s4, 4096 }
  0x14   :  { %s39_s20 = sshll.u32 %s2978_s19, 4  ;;  %p2926_p8 = scmp.ne.s32.totalorder %s3731_s4, %s2925_s23  ;;  %s40_s20 = int_to_ptr.vmem [resolvable:$true] %s39_s20 }
  0x15   :  { %p2929_p9 = scmp.lt.u32.totalorder %s2925_s23, %s3731_s4 }
  0x17   :  { %p2931_p10 = pnand %p2929_p9, %p2926_p8 }
  0x19   :  { %2934 = shalt.err (!%p2931_p10)
}
  0x1a   :  { %s2935_s29 = scalar_lea.vmem %s40_s20, 4096  ;;  %p2940_p12 = scmp.lt.s32.totalorder %s40_s20, %s40_s20 }
  0x1b   :  { %p2936_p11 = scmp.ne.s32.totalorder %s40_s20, %s2935_s29  ;;  %p2941_p13 = scmp.lt.s32.totalorder %s2935_s29, %s2935_s29 }
  0x1d   :  { %p2942_p0 = por %p2941_p13, %p2940_p12 }
  0x1f   :  { %p2943_p1 = pnand %p2942_p0, %p2936_p11 }
  0x21   :  { %2946 = shalt.err (!%p2943_p1)
}
  0x22   :  { %45 = dma.hbm_to_vmem [thread:$0]  %s3731_s4, 4096, %s40_s20, [#allocation7], %s2976_s15, %s2976_s15, %s2977_s16  }
  0x23   :  { %2969 = dma.done.wait [#allocation4], 4096  }
  0x24   :  { %2970 = vsyncadd [#allocation4], 4294963200 }
  0x25   :  { %2971 = dma.done.wait [#allocation7], 4096  }
  0x26   :  { %2972 = vsyncadd [#allocation7], 4294963200  ;;  %v2979_v0 = vmov 0   ;;  %v2597_v1 = vld [vmem:[#allocation3 + $0x4] ss:$16 sps:$4 sm:$0xff]   ;;  %vm1037_vm0 = vcmask 1041409  }
  0x27   :  { %325 = vmatprep.mubr.bf16.mxu0 %v2979_v0  ;;  %368 = vmatprep.mubr.bf16.mxu1 %v2979_v0  ;;  %v2599_v2 = vld [vmem:[#allocation3 + $0xc] ss:$16 sps:$4 sm:$0xff]   ;;  %v2601_v3 = vld [vmem:[#allocation3] ss:$16 sps:$4 sm:$0xff]   ;;  %v2602_v4 = vld [vmem:[#allocation3 + $0x8] ss:$16 sps:$4 sm:$0xff]  }
  0x28   :  { %293 = vmatprep.subr.bf16.mxu0 %v2597_v1  ;;  %336 = vmatprep.subr.bf16.mxu1 %v2599_v2  ;;  %v2603_v5 = vld [vmem:[#allocation3 + $0x24] ss:$16 sps:$4 sm:$0xff]   ;;  %v2605_v6 = vld [vmem:[#allocation3 + $0x2c] ss:$16 sps:$4 sm:$0xff]   ;;  %v2607_v7 = vld [vmem:[#allocation3 + $0x20] ss:$16 sps:$4 sm:$0xff]  }
  0x29   :  { %294 = vmatpush1.bf16.msra.mxu0 %v2601_v3  ;;  %337 = vmatpush1.bf16.msra.mxu1 %v2602_v4  ;;  %v2608_v8 = vld [vmem:[#allocation3 + $0x28] ss:$16 sps:$4 sm:$0xff]   ;;  %v2609_v9 = vld [vmem:[#allocation3 + $0x44] ss:$16 sps:$4 sm:$0xff]   ;;  %v2611_v10 = vld [vmem:[#allocation3 + $0x4c] ss:$16 sps:$4 sm:$0xff]  }
  0x2a   :  { %295 = vmatprep.subr.bf16.mxu0 %v2603_v5  ;;  %338 = vmatprep.subr.bf16.mxu1 %v2605_v6  ;;  %v2613_v11 = vld [vmem:[#allocation3 + $0x40] ss:$16 sps:$4 sm:$0xff]   ;;  %v2614_v12 = vld [vmem:[#allocation3 + $0x48] ss:$16 sps:$4 sm:$0xff]   ;;  %v2615_v13 = vld [vmem:[#allocation3 + $0x64] ss:$16 sps:$4 sm:$0xff]  }
  0x2b   :  { %v2617_v14 = vld [vmem:[#allocation3 + $0x6c] ss:$16 sps:$4 sm:$0xff]   ;;  %v2619_v15 = vld [vmem:[#allocation3 + $0x60] ss:$16 sps:$4 sm:$0xff]   ;;  %v2620_v16 = vld [vmem:[#allocation3 + $0x68] ss:$16 sps:$4 sm:$0xff]  }
  0x2c   :  { %v2621_v17 = vld [vmem:[#allocation3 + $0x84] ss:$16 sps:$4 sm:$0xff]   ;;  %v2623_v18 = vld [vmem:[#allocation3 + $0x8c] ss:$16 sps:$4 sm:$0xff]   ;;  %v2625_v19 = vld [vmem:[#allocation3 + $0x80] ss:$16 sps:$4 sm:$0xff]  }
  0x2d   :  { %296 = vmatpush1.bf16.msra.mxu0 %v2607_v7  ;;  %339 = vmatpush1.bf16.msra.mxu1 %v2608_v8  ;;  %v2626_v20 = vld [vmem:[#allocation3 + $0x88] ss:$16 sps:$4 sm:$0xff]   ;;  %v2627_v21 = vld [vmem:[#allocation3 + $0xa4] ss:$16 sps:$4 sm:$0xff]   ;;  %v2629_v22 = vld [vmem:[#allocation3 + $0xac] ss:$16 sps:$4 sm:$0xff]  }
  0x2e   :  { %297 = vmatprep.subr.bf16.mxu0 %v2609_v9  ;;  %340 = vmatprep.subr.bf16.mxu1 %v2611_v10  ;;  %v2631_v23 = vld [vmem:[#allocation3 + $0xa0] ss:$16 sps:$4 sm:$0xff]   ;;  %v2632_v24 = vld [vmem:[#allocation3 + $0xa8] ss:$16 sps:$4 sm:$0xff]   ;;  %v2633_v25 = vld [vmem:[#allocation3 + $0xc4] ss:$16 sps:$4 sm:$0xff]  }
  0x2f   :  { %v2635_v26 = vld [vmem:[#allocation3 + $0xcc] ss:$16 sps:$4 sm:$0xff]   ;;  %v2637_v27 = vld [vmem:[#allocation3 + $0xc0] ss:$16 sps:$4 sm:$0xff]   ;;  %v2638_v28 = vld [vmem:[#allocation3 + $0xc8] ss:$16 sps:$4 sm:$0xff]  }
  0x30   :  { %v2639_v29 = vld [vmem:[#allocation3 + $0xe4] ss:$16 sps:$4 sm:$0xff]   ;;  %v2641_v30 = vld [vmem:[#allocation3 + $0xec] ss:$16 sps:$4 sm:$0xff]   ;;  %v2643_v31 = vld [vmem:[#allocation3 + $0xe0] ss:$16 sps:$4 sm:$0xff]  }
  0x31   :  { %298 = vmatpush1.bf16.msra.mxu0 %v2613_v11  ;;  %341 = vmatpush1.bf16.msra.mxu1 %v2614_v12  ;;  %v2644_v32 = vld [vmem:[#allocation3 + $0xe8] ss:$16 sps:$4 sm:$0xff]   ;;  %v2647_v33 = vld [vmem:[%s3729_s2 + $0x4] ss:$16 sps:$4 sm:$0xff]   ;;  %v2650_v34 = vld [vmem:[%s3729_s2 + $0xc] ss:$16 sps:$4 sm:$0xff]  }
  0x32   :  { %299 = vmatprep.subr.bf16.mxu0 %v2615_v13  ;;  %342 = vmatprep.subr.bf16.mxu1 %v2617_v14  ;;  %v2645_v35 = vld [vmem:[%s3729_s2] ss:$16 sps:$4 sm:$0xff]   ;;  %v2648_v37 = vld [vmem:[%s3729_s2 + $0x8] ss:$16 sps:$4 sm:$0xff]   ;;  %v2654_v38 = vld [vmem:[%s3729_s2 + $0x24] ss:$16 sps:$4 sm:$0xff]  }
  0x33   :  { %v2651_v36 = vld [vmem:[%s3728_s1] sm:$0xff]   ;;  %v2657_v39 = vld [vmem:[%s3729_s2 + $0x2c] ss:$16 sps:$4 sm:$0xff]   ;;  %v2655_v41 = vld [vmem:[%s3729_s2 + $0x28] ss:$16 sps:$4 sm:$0xff]   ;;  %vm2982_vm1 = vmmov 0  }
  0x34   :  { %v2652_v40 = vld [vmem:[%s3729_s2 + $0x20] ss:$16 sps:$4 sm:$0xff]   ;;  %v2660_v42 = vld [vmem:[%s3729_s2 + $0x44] ss:$16 sps:$4 sm:$0xff]   ;;  %v2663_v43 = vld [vmem:[%s3729_s2 + $0x4c] ss:$16 sps:$4 sm:$0xff]  }
  0x35   :  { %300 = vmatpush1.bf16.msra.mxu0 %v2619_v15  ;;  %343 = vmatpush1.bf16.msra.mxu1 %v2620_v16  ;;  %v2658_v44 = vld [vmem:[%s3729_s2 + $0x40] ss:$16 sps:$4 sm:$0xff]   ;;  %v2661_v45 = vld [vmem:[%s3729_s2 + $0x48] ss:$16 sps:$4 sm:$0xff]   ;;  %v2666_v46 = vld [vmem:[%s3729_s2 + $0x64] ss:$16 sps:$4 sm:$0xff]  }
  0x36   :  { %301 = vmatprep.subr.bf16.mxu0 %v2621_v17  ;;  %344 = vmatprep.subr.bf16.mxu1 %v2623_v18  ;;  %v2669_v47 = vld [vmem:[%s3729_s2 + $0x6c] ss:$16 sps:$4 sm:$0xff]   ;;  %v2664_v48 = vld [vmem:[%s3729_s2 + $0x60] ss:$16 sps:$4 sm:$0xff]   ;;  %v2667_v49 = vld [vmem:[%s3729_s2 + $0x68] ss:$16 sps:$4 sm:$0xff]  }
  0x37   :  { %v2672_v50 = vld [vmem:[%s3729_s2 + $0x84] ss:$16 sps:$4 sm:$0xff]   ;;  %v2675_v51 = vld [vmem:[%s3729_s2 + $0x8c] ss:$16 sps:$4 sm:$0xff]   ;;  %v2670_v52 = vld [vmem:[%s3729_s2 + $0x80] ss:$16 sps:$4 sm:$0xff]  }
  0x38   :  { %v2673_v53 = vld [vmem:[%s3729_s2 + $0x88] ss:$16 sps:$4 sm:$0xff]   ;;  %v2678_v54 = vld [vmem:[%s3729_s2 + $0xa4] ss:$16 sps:$4 sm:$0xff]   ;;  %v2681_v55 = vld [vmem:[%s3729_s2 + $0xac] ss:$16 sps:$4 sm:$0xff]  }
  0x39   :  { %302 = vmatpush1.bf16.msra.mxu0 %v2625_v19  ;;  %345 = vmatpush1.bf16.msra.mxu1 %v2626_v20  ;;  %v2676_v56 = vld [vmem:[%s3729_s2 + $0xa0] ss:$16 sps:$4 sm:$0xff]   ;;  %v2679_v57 = vld [vmem:[%s3729_s2 + $0xa8] ss:$16 sps:$4 sm:$0xff]   ;;  %v2684_v58 = vld [vmem:[%s3729_s2 + $0xc4] ss:$16 sps:$4 sm:$0xff]  }
  0x3a   :  { %303 = vmatprep.subr.bf16.mxu0 %v2627_v21  ;;  %346 = vmatprep.subr.bf16.mxu1 %v2629_v22  ;;  %v2687_v59 = vld [vmem:[%s3729_s2 + $0xcc] ss:$16 sps:$4 sm:$0xff]   ;;  %v2682_v60 = vld [vmem:[%s3729_s2 + $0xc0] ss:$16 sps:$4 sm:$0xff]   ;;  %v2685_v61 = vld [vmem:[%s3729_s2 + $0xc8] ss:$16 sps:$4 sm:$0xff]  }
  0x3b   :  { %v2690_v62 = vld [vmem:[%s3729_s2 + $0xe4] ss:$16 sps:$4 sm:$0xff]   ;;  %v2693_v63 = vld [vmem:[%s3729_s2 + $0xec] ss:$16 sps:$4 sm:$0xff]   ;;  %v2688_v1 = vld [vmem:[%s3729_s2 + $0xe0] ss:$16 sps:$4 sm:$0xff]  }
  0x3c   :  { %v2691_v2 = vld [vmem:[%s3729_s2 + $0xe8] ss:$16 sps:$4 sm:$0xff]   ;;  %v3157_v3 = vld [vmem:[#allocation6 + $0x4] ss:$16 sps:$4 sm:$0xff]   ;;  %v3159_v4 = vld [vmem:[#allocation6 + $0xc] ss:$16 sps:$4 sm:$0xff]  }
  0x3d   :  { %304 = vmatpush1.bf16.msra.mxu0 %v2631_v23  ;;  %347 = vmatpush1.bf16.msra.mxu1 %v2632_v24  ;;  %v2694_v5 = vld [vmem:[%s3727_s0] sm:$0xff]   ;;  %v3166_v7 = vld [vmem:[#allocation6 + $0x8] ss:$16 sps:$4 sm:$0xff]   ;;  %v3172_v9 = vld [vmem:[#allocation6 + $0x2c] ss:$16 sps:$4 sm:$0xff]   ;;  %s2984_s29 = smov [#allocation8]  }
  0x3e   :  { %305 = vmatprep.subr.bf16.mxu0 %v2633_v25  ;;  %348 = vmatprep.subr.bf16.mxu1 %v2635_v26  ;;  %v3164_v6 = vld [vmem:[#allocation6] ss:$16 sps:$4 sm:$0xff]   ;;  %v3170_v8 = vld [vmem:[#allocation6 + $0x24] ss:$16 sps:$4 sm:$0xff]   ;;  %v3178_v11 = vld [vmem:[#allocation6 + $0x28] ss:$16 sps:$4 sm:$0xff]  }
  0x3f   :  { %v3176_v10 = vld [vmem:[#allocation6 + $0x20] ss:$16 sps:$4 sm:$0xff]   ;;  %v3182_v12 = vld [vmem:[#allocation6 + $0x44] ss:$16 sps:$4 sm:$0xff]   ;;  %v3184_v13 = vld [vmem:[#allocation6 + $0x4c] ss:$16 sps:$4 sm:$0xff]  }
  0x40   :  { %v3190_v14 = vld [vmem:[#allocation6 + $0x40] ss:$16 sps:$4 sm:$0xff]   ;;  %v3192_v15 = vld [vmem:[#allocation6 + $0x48] ss:$16 sps:$4 sm:$0xff]   ;;  %v3196_v16 = vld [vmem:[#allocation6 + $0x64] ss:$16 sps:$4 sm:$0xff]  }
  0x41   :  { %306 = vmatpush1.bf16.msra.mxu0 %v2637_v27  ;;  %349 = vmatpush1.bf16.msra.mxu1 %v2638_v28  ;;  %v3198_v17 = vld [vmem:[#allocation6 + $0x6c] ss:$16 sps:$4 sm:$0xff]   ;;  %v3202_v18 = vld [vmem:[#allocation6 + $0x60] ss:$16 sps:$4 sm:$0xff]   ;;  %v3204_v19 = vld [vmem:[#allocation6 + $0x68] ss:$16 sps:$4 sm:$0xff]  }
  0x42   :  { %307 = vmatprep.subr.bf16.mxu0 %v2639_v29  ;;  %350 = vmatprep.subr.bf16.mxu1 %v2641_v30  ;;  %v3208_v20 = vld [vmem:[#allocation6 + $0x84] ss:$16 sps:$4 sm:$0xff]   ;;  %v3210_v21 = vld [vmem:[#allocation6 + $0x8c] ss:$16 sps:$4 sm:$0xff]   ;;  %v3214_v22 = vld [vmem:[#allocation6 + $0x80] ss:$16 sps:$4 sm:$0xff]  }
  0x43   :  { %v3216_v23 = vld [vmem:[#allocation6 + $0x88] ss:$16 sps:$4 sm:$0xff]   ;;  %v3220_v24 = vld [vmem:[#allocation6 + $0xa4] ss:$16 sps:$4 sm:$0xff]   ;;  %v3222_v25 = vld [vmem:[#allocation6 + $0xac] ss:$16 sps:$4 sm:$0xff]  }
  0x44   :  { %v3226_v26 = vld [vmem:[#allocation6 + $0xa0] ss:$16 sps:$4 sm:$0xff]   ;;  %v3228_v27 = vld [vmem:[#allocation6 + $0xa8] ss:$16 sps:$4 sm:$0xff]   ;;  %v3232_v28 = vld [vmem:[#allocation6 + $0xc4] ss:$16 sps:$4 sm:$0xff]  }
  0x45   :  { %308 = vmatpush1.bf16.msra.mxu0 %v2643_v31  ;;  %351 = vmatpush1.bf16.msra.mxu1 %v2644_v32  ;;  %v3234_v29 = vld [vmem:[#allocation6 + $0xcc] ss:$16 sps:$4 sm:$0xff]   ;;  %v3238_v30 = vld [vmem:[#allocation6 + $0xc0] ss:$16 sps:$4 sm:$0xff]   ;;  %v3240_v31 = vld [vmem:[#allocation6 + $0xc8] ss:$16 sps:$4 sm:$0xff]  }
  0x46   :  { %545 = vmatprep.subr.bf16.mxu0 %v2647_v33  ;;  %588 = vmatprep.subr.bf16.mxu1 %v2650_v34  ;;  %v3244_v32 = vld [vmem:[#allocation6 + $0xe4] ss:$16 sps:$4 sm:$0xff]   ;;  %v3246_v33 = vld [vmem:[#allocation6 + $0xec] ss:$16 sps:$4 sm:$0xff]   ;;  %v3250_v34 = vld [vmem:[#allocation6 + $0xe0] ss:$16 sps:$4 sm:$0xff]  }
  0x47   :  { %s2378_s3 = sshll.u32 %s2984_s29, 4  ;;  %vm2370_vm2 = vcmask 58368   ;;  %s2379_s3 = int_to_ptr.vmem [resolvable:$true] %s2378_s3 }
  0x48   :  { %326 = vmatmul.mubr.bf16.vlgmr.msra.gmra.mrb[0].mxu0 %v2651_v36  ;;  %369 = vmatmul.mubr.bf16.vlgmr.msra.gmra.mrb[0].mxu1 %v2651_v36  ;;  %v633_v36 = vlaneseq  ;;  %s2947_s28 = scalar_lea.vmem %s2379_s3, 32  ;;  %p2952_p3 = scmp.lt.s32.totalorder %s2379_s3, %s2379_s3 }
  0x49   :  { %546 = vmatpush1.bf16.msra.mxu0 %v2645_v35  ;;  %589 = vmatpush1.bf16.msra.mxu1 %v2648_v37  ;;  %v3252_v35 = vld [vmem:[#allocation6 + $0xe8] ss:$16 sps:$4 sm:$0xff]   ;;  %p2948_p2 = scmp.ne.s32.totalorder %s2379_s3, %s2947_s28  ;;  %p2953_p4 = scmp.lt.s32.totalorder %s2947_s28, %s2947_s28 }
  0x4a   :  { %547 = vmatprep.subr.bf16.mxu0 %v2654_v38  ;;  %590 = vmatprep.subr.bf16.mxu1 %v2657_v39  ;;  %v634_v37 = vshrl.u32 %v633_v36, 7 }
  0x4b   :  { %577 = vmatprep.mubr.bf16.mxu0 %v2979_v0  ;;  %620 = vmatprep.mubr.bf16.mxu1 %v2979_v0  ;;  %p2954_p5 = por %p2953_p4, %p2952_p3 }
  0x4c   :  { %v635_v38 = vsub.s32 0, %v634_v37  ;;  %v643_v39 = vsub.s32 2, %v634_v37 }
  0x4d   :  { %548 = vmatpush1.bf16.msra.mxu0 %v2652_v40  ;;  %591 = vmatpush1.bf16.msra.mxu1 %v2655_v41  ;;  %v631_v40 = vld [vmem:[%s3732_s5] sm:$0xf]  ;;  %v639_v41 = vsub.s32 1, %v634_v37  ;;  %p2955_p6 = pnand %p2954_p5, %p2948_p2 }
  0x4e   :  { %549 = vmatprep.subr.bf16.mxu0 %v2660_v42  ;;  %592 = vmatprep.subr.bf16.mxu1 %v2663_v43  ;;  %v647_v42 = vsub.s32 3, %v634_v37  ;;  %v636_v43 = vrot.slane %v631_v40, %v635_v38 }
  0x51   :  { %550 = vmatpush1.bf16.msra.mxu0 %v2658_v44  ;;  %593 = vmatpush1.bf16.msra.mxu1 %v2661_v45  ;;  %v644_v44 = vrot.slane %v631_v40, %v643_v39  ;;  %v640_v45 = vrot.slane %v631_v40, %v639_v41 }
  0x52   :  { %551 = vmatprep.subr.bf16.mxu0 %v2666_v46  ;;  %594 = vmatprep.subr.bf16.mxu1 %v2669_v47  ;;  %v648_v46 = vrot.slane %v631_v40, %v647_v42 }
  0x55   :  { %552 = vmatpush1.bf16.msra.mxu0 %v2664_v48  ;;  %595 = vmatpush1.bf16.msra.mxu1 %v2667_v49 }
  0x56   :  { %553 = vmatprep.subr.bf16.mxu0 %v2672_v50  ;;  %596 = vmatprep.subr.bf16.mxu1 %v2675_v51 }
  0x59   :  { %554 = vmatpush1.bf16.msra.mxu0 %v2670_v52  ;;  %597 = vmatpush1.bf16.msra.mxu1 %v2673_v53 }
  0x5a   :  { %555 = vmatprep.subr.bf16.mxu0 %v2678_v54  ;;  %598 = vmatprep.subr.bf16.mxu1 %v2681_v55 }
  0x5d   :  { %556 = vmatpush1.bf16.msra.mxu0 %v2676_v56  ;;  %599 = vmatpush1.bf16.msra.mxu1 %v2679_v57 }
  0x5e   :  { %557 = vmatprep.subr.bf16.mxu0 %v2684_v58  ;;  %600 = vmatprep.subr.bf16.mxu1 %v2687_v59 }
  0x61   :  { %558 = vmatpush1.bf16.msra.mxu0 %v2682_v60  ;;  %601 = vmatpush1.bf16.msra.mxu1 %v2685_v61 }
  0x62   :  { %559 = vmatprep.subr.bf16.mxu0 %v2690_v62  ;;  %602 = vmatprep.subr.bf16.mxu1 %v2693_v63  ;;  %v2980_v63 = vmov 1966171168  }
  0x65   :  { %560 = vmatpush1.bf16.msra.mxu0 %v2688_v1  ;;  %603 = vmatpush1.bf16.msra.mxu1 %v2691_v2  ;;  %v953_v1 = vunpack.c.l.s4 %v2980_v63 }
  0x66   :  { %864 = vmatprep.subr.bf16.mxu0 %v3157_v3  ;;  %905 = vmatprep.subr.bf16.mxu1 %v3159_v4 }
  0x67   :  { %v954_v2 = vunpack.c.0.s8 %v953_v1 }
  0x68   :  { %578 = vmatmul.mubr.bf16.vlgmr.msra.gmra.mrb[0].mxu0 %v2694_v5  ;;  %621 = vmatmul.mubr.bf16.vlgmr.msra.gmra.mrb[0].mxu1 %v2694_v5 }
  0x69   :  { %865 = vmatpush1.bf16.msra.mxu0 %v3164_v6  ;;  %906 = vmatpush1.bf16.msra.mxu1 %v3166_v7  ;;  %v3299_v5 = vsub.s32 %v954_v2, %v634_v37 }
  0x6a   :  { %866 = vmatprep.subr.bf16.mxu0 %v3170_v8  ;;  %907 = vmatprep.subr.bf16.mxu1 %v3172_v9 }
  0x6b   :  { %896 = vmatprep.mubr.bf16.mxu0 %v2979_v0  ;;  %937 = vmatprep.mubr.bf16.mxu1 %v2979_v0 }
  0x6d   :  { %867 = vmatpush1.bf16.msra.mxu0 %v3176_v10  ;;  %908 = vmatpush1.bf16.msra.mxu1 %v3178_v11 }
  0x6e   :  { %868 = vmatprep.subr.bf16.mxu0 %v3182_v12  ;;  %909 = vmatprep.subr.bf16.mxu1 %v3184_v13 }
  0x71   :  { %869 = vmatpush1.bf16.msra.mxu0 %v3190_v14  ;;  %910 = vmatpush1.bf16.msra.mxu1 %v3192_v15 }
  0x72   :  { %870 = vmatprep.subr.bf16.mxu0 %v3196_v16  ;;  %911 = vmatprep.subr.bf16.mxu1 %v3198_v17 }
  0x75   :  { %871 = vmatpush1.bf16.msra.mxu0 %v3202_v18  ;;  %912 = vmatpush1.bf16.msra.mxu1 %v3204_v19 }
  0x76   :  { %872 = vmatprep.subr.bf16.mxu0 %v3208_v20  ;;  %913 = vmatprep.subr.bf16.mxu1 %v3210_v21 }
  0x79   :  { %873 = vmatpush1.bf16.msra.mxu0 %v3214_v22  ;;  %914 = vmatpush1.bf16.msra.mxu1 %v3216_v23 }
  0x7a   :  { %874 = vmatprep.subr.bf16.mxu0 %v3220_v24  ;;  %915 = vmatprep.subr.bf16.mxu1 %v3222_v25 }
  0x7d   :  { %875 = vmatpush1.bf16.msra.mxu0 %v3226_v26  ;;  %916 = vmatpush1.bf16.msra.mxu1 %v3228_v27 }
  0x7e   :  { %876 = vmatprep.subr.bf16.mxu0 %v3232_v28  ;;  %917 = vmatprep.subr.bf16.mxu1 %v3234_v29 }
  0x81   :  { %877 = vmatpush1.bf16.msra.mxu0 %v3238_v30  ;;  %918 = vmatpush1.bf16.msra.mxu1 %v3240_v31 }
  0x82   :  { %878 = vmatprep.subr.bf16.mxu0 %v3244_v32  ;;  %919 = vmatprep.subr.bf16.mxu1 %v3246_v33 }
  0x85   :  { %879 = vmatpush1.bf16.msra.mxu0 %v3250_v34  ;;  %920 = vmatpush1.bf16.msra.mxu1 %v3252_v35 }
  0x86   :  { %1041 = vmatprep.subr.bf16.mxu0 %v3157_v3  ;;  %1082 = vmatprep.subr.bf16.mxu1 %v3159_v4 }
  0x88   :  { %897 = vmatmul.mubr.bf16.vlgmr.msra.gmra.mrb[4].mxu0 %v2979_v0  ;;  %938 = vmatmul.mubr.bf16.vlgmr.msra.gmra.mrb[4].mxu1 %v2979_v0 }
  0x89   :  { %1042 = vmatpush1.bf16.msra.mxu0 %v3164_v6  ;;  %1083 = vmatpush1.bf16.msra.mxu1 %v3166_v7 }
  0x8a   :  { %1043 = vmatprep.subr.bf16.mxu0 %v3170_v8  ;;  %1084 = vmatprep.subr.bf16.mxu1 %v3172_v9 }
  0x8b   :  { %1073 = vmatprep.mubr.bf16.mxu0 %v2979_v0  ;;  %1114 = vmatprep.mubr.bf16.mxu1 %v2979_v0 }
  0x8d   :  { %1044 = vmatpush1.bf16.msra.mxu0 %v3176_v10  ;;  %1085 = vmatpush1.bf16.msra.mxu1 %v3178_v11 }
  0x8e   :  { %1045 = vmatprep.subr.bf16.mxu0 %v3182_v12  ;;  %1086 = vmatprep.subr.bf16.mxu1 %v3184_v13 }
  0x91   :  { %1046 = vmatpush1.bf16.msra.mxu0 %v3190_v14  ;;  %1087 = vmatpush1.bf16.msra.mxu1 %v3192_v15 }
  0x92   :  { %1047 = vmatprep.subr.bf16.mxu0 %v3196_v16  ;;  %1088 = vmatprep.subr.bf16.mxu1 %v3198_v17 }
  0x95   :  { %1048 = vmatpush1.bf16.msra.mxu0 %v3202_v18  ;;  %1089 = vmatpush1.bf16.msra.mxu1 %v3204_v19 }
  0x96   :  { %1049 = vmatprep.subr.bf16.mxu0 %v3208_v20  ;;  %1090 = vmatprep.subr.bf16.mxu1 %v3210_v21 }
  0x99   :  { %1050 = vmatpush1.bf16.msra.mxu0 %v3214_v22  ;;  %1091 = vmatpush1.bf16.msra.mxu1 %v3216_v23 }
  0x9a   :  { %1051 = vmatprep.subr.bf16.mxu0 %v3220_v24  ;;  %1092 = vmatprep.subr.bf16.mxu1 %v3222_v25 }
  0x9d   :  { %1052 = vmatpush1.bf16.msra.mxu0 %v3226_v26  ;;  %1093 = vmatpush1.bf16.msra.mxu1 %v3228_v27 }
  0x9e   :  { %1053 = vmatprep.subr.bf16.mxu0 %v3232_v28  ;;  %1094 = vmatprep.subr.bf16.mxu1 %v3234_v29 }
  0xa1   :  { %1054 = vmatpush1.bf16.msra.mxu0 %v3238_v30  ;;  %1095 = vmatpush1.bf16.msra.mxu1 %v3240_v31 }
  0xa2   :  { %1055 = vmatprep.subr.bf16.mxu0 %v3244_v32  ;;  %1096 = vmatprep.subr.bf16.mxu1 %v3246_v33 }
  0xa5   :  { %1056 = vmatpush1.bf16.msra.mxu0 %v3250_v34  ;;  %1097 = vmatpush1.bf16.msra.mxu1 %v3252_v35 }
  0xa6   :  { %1217 = vmatprep.subr.bf16.mxu0 %v3157_v3  ;;  %1258 = vmatprep.subr.bf16.mxu1 %v3159_v4 }
 0x13b   :  { %v579_v47 = vpop.f32.mrb[0].mxu0  ;;  %v622_v48 = vpop.f32.mrb[0].mxu1 }
 0x13c   :  { %v653_v49 = vadd.f32 %v636_v43, %v579_v47  ;;  %v655_v50 = vadd.f32 %v644_v44, %v622_v48  ;;  %v581_v51 = vpop.f32.mrb[1].mxu0  ;;  %v624_v52 = vpop.f32.mrb[1].mxu1 }
 0x13d   :  { %v654_v53 = vadd.f32 %v640_v45, %v581_v51  ;;  %v656_v54 = vadd.f32 %v648_v46, %v624_v52  ;;  %v583_v55 = vpop.f32.mrb[2].mxu0  ;;  %v626_v56 = vpop.f32.mrb[2].mxu1 }
 0x13e   :  { %661 = vst [vmem:[#allocation2] sm:$0xff] %v653_v49  ;;  %663 = vst [vmem:[#allocation2 + $0x10] sm:$0xff] %v655_v50  ;;  %v657_v57 = vadd.f32 %v636_v43, %v583_v55  ;;  %v659_v58 = vadd.f32 %v644_v44, %v626_v56  ;;  %v585_v59 = vpop.f32.mrb[3].mxu0  ;;  %v628_v60 = vpop.f32.mrb[3].mxu1 }
 0x13f   :  { %662 = vst [vmem:[#allocation2 + $0x8] sm:$0xff] %v654_v53  ;;  %664 = vst [vmem:[#allocation2 + $0x18] sm:$0xff] %v656_v54  ;;  %v658_v61 = vadd.f32 %v640_v45, %v585_v59  ;;  %v660_v62 = vadd.f32 %v648_v46, %v628_v60 }
 0x140   :  { %665 = vst [vmem:[#allocation2 + $0x20] sm:$0xff] %v657_v57  ;;  %667 = vst [vmem:[#allocation2 + $0x30] sm:$0xff] %v659_v58 }
 0x141   :  { %666 = vst [vmem:[#allocation2 + $0x28] sm:$0xff] %v658_v61  ;;  %668 = vst [vmem:[#allocation2 + $0x38] sm:$0xff] %v660_v62 }
 0x146   :  { %v701_v52 = vld [vmem:[#allocation2] ss:$8 sm:$0xf] }
 0x148   :  { %v703_v53 = vld [vmem:[#allocation2 + $0x20] ss:$8 sm:$0xf] }
 0x15b   :  { %v898_v36 = vpop.f32.mrb[4].mxu0  ;;  %v939_v38 = vpop.f32.mrb[4].mxu1 }
 0x15c   :  { %v900_v39 = vpop.f32.mrb[5].mxu0  ;;  %v941_v40 = vpop.f32.mrb[5].mxu1 }
 0x15d   :  { %v950_v41 = vcombine.low %v898_v36, %v900_v39  ;;  %v951_v42 = vcombine.low %v939_v38, %v941_v40  ;;  %v902_v43 = vpop.f32.mrb[6].mxu0  ;;  %v943_v44 = vpop.f32.mrb[6].mxu1 }
 0x15e   :  { %v903_v47 = vpop.f32.mrb[7].mxu0  ;;  %v944_v45 = vpop.f32.mrb[7].mxu1 }
 0x15f   :  { %v958_v46 = vrot.slane %v950_v41, %v3299_v5  ;;  %v965_v48 = vrot.slane %v951_v42, %v3299_v5 }
 0x161   :  { %v966_v49 = vcombine.low %v958_v46, %v965_v48  ;;  %v967_v50 = vcombine.high %v958_v46, %v965_v48 }
 0x163   :  { %v974_v51 = vrot.slane %v966_v49, %v3299_v5  ;;  %v981_v37 = vrot.slane %v967_v50, %v3299_v5 }
 0x165   :  { %v984_v54 = vadd.f32 %v974_v51, %v701_v52  ;;  %v985_v55 = vadd.f32 %v981_v37, %v703_v53 }
 0x167   :  { %v2486_v56 = vmul.f32 -1.442695, %v984_v54  ;;  %v2487_v57 = vmul.f32 -1.442695, %v985_v55  ;;  %v1000_v61 = vrot.slane %v984_v54, 3  ;;  %v1001_v63 = vrot.slane %v985_v55, 3 }
 0x169   :  { %2743 = vpow2.f32 %v2486_v56 }
 0x16a   :  { %2745 = vpow2.f32 %v2487_v57 }
 0x173   :  { %v2744_v58 = vpop.eup %2743 }
 0x174   :  { %v2746_v59 = vpop.eup %2745  ;;  %v992_v60 = vadd.f32 1.0, %v2744_v58 }
 0x175   :  { %v993_v62 = vadd.f32 1.0, %v2746_v59 }
 0x176   :  { %2747 = vrcp.f32 %v992_v60 }
 0x177   :  { %2749 = vrcp.f32 %v993_v62 }
 0x178   :  { %2751 = vtanh.f32 %v1000_v61 }
 0x179   :  { %2753 = vtanh.f32 %v1001_v63 }
 0x180   :  { %v2748_v1 = vpop.eup %2747 }
 0x181   :  { %v2750_v2 = vpop.eup %2749  ;;  %v1008_v36 = vrot.slane %v2748_v1, 1  ;;  %v1020_v46 = vrot.slane %v2748_v1, 2 }
 0x182   :  { %v2752_v38 = vpop.eup %2751  ;;  %v1009_v39 = vrot.slane %v2750_v2, 1  ;;  %v1021_v49 = vrot.slane %v2750_v2, 2 }
 0x183   :  { %v2754_v40 = vpop.eup %2753  ;;  %v1012_v41 = vmul.f32 0.0, %v1008_v36  ;;  %v1014_v42 = vmul.f32 %v2752_v38, %v2748_v1 }
 0x184   :  { %v1013_v43 = vmul.f32 0.0, %v1009_v39  ;;  %v1015_v44 = vmul.f32 %v2754_v40, %v2750_v2 }
 0x185   :  { %v3305_v47 = vadd.f32 %v1014_v42, %v1012_v41 }
 0x186   :  { %v3307_v45 = vadd.f32 %v1015_v44, %v1013_v43 }
 0x187   :  { %2755 = vtanh.f32 %v3305_v47 }
 0x188   :  { %2757 = vtanh.f32 %v3307_v45 }
 0x191   :  { %v2756_v48 = vpop.eup %2755 }
 0x192   :  { %v2758_v50 = vpop.eup %2757  ;;  %v1024_v51 = vmul.f32 %v2756_v48, %v1020_v46  ;;  %v1027_v48 = vld [vmem:[#allocation2 + $0x1] ss:$8 sm:$0xf] }
 0x193   :  { %v1025_v37 = vmul.f32 %v2758_v50, %v1021_v49  ;;  %v1029_v49 = vld [vmem:[#allocation2 + $0x21] ss:$8 sm:$0xf] }
 0x194   :  { %v1030_v52 = vpack.c.bf16 %v1024_v51, %v1024_v51 }
 0x195   :  { %v1031_v53 = vpack.c.bf16 %v1025_v37, %v1025_v37 }
 0x196   :  { %v1034_v55 = vunpack.c.l.b16 %v1030_v52 }
 0x197   :  { %v1035_v54 = vunpack.c.l.b16 %v1031_v53 }
 0x199   :  { %v1036_v56 = vrot.slane %v1035_v54, 7 }
 0x19b   :  { %v1038_v57 = vsel %vm1037_vm0, %v1036_v56, %v1034_v55 }
 0x19c   :  { %v1039_v58 = vpack.c.b16 %v1038_v57, %v1038_v57 }
 0x19e   :  { %1074 = vmatmul.mubr.bf16.vlgmr.msra.gmra.mrb[8].mxu0 %v1039_v58  ;;  %1115 = vmatmul.mubr.bf16.vlgmr.msra.gmra.mrb[8].mxu1 %v1039_v58 }
 0x19f   :  { %1218 = vmatpush1.bf16.msra.mxu0 %v3164_v6  ;;  %1259 = vmatpush1.bf16.msra.mxu1 %v3166_v7 }
 0x1a0   :  { %1219 = vmatprep.subr.bf16.mxu0 %v3170_v8  ;;  %1260 = vmatprep.subr.bf16.mxu1 %v3172_v9 }
 0x1a1   :  { %1249 = vmatprep.mubr.bf16.mxu0 %v2979_v0  ;;  %1290 = vmatprep.mubr.bf16.mxu1 %v2979_v0 }
 0x1a3   :  { %1220 = vmatpush1.bf16.msra.mxu0 %v3176_v10  ;;  %1261 = vmatpush1.bf16.msra.mxu1 %v3178_v11 }
 0x1a4   :  { %1221 = vmatprep.subr.bf16.mxu0 %v3182_v12  ;;  %1262 = vmatprep.subr.bf16.mxu1 %v3184_v13 }
 0x1a7   :  { %1222 = vmatpush1.bf16.msra.mxu0 %v3190_v14  ;;  %1263 = vmatpush1.bf16.msra.mxu1 %v3192_v15 }
 0x1a8   :  { %1223 = vmatprep.subr.bf16.mxu0 %v3196_v16  ;;  %1264 = vmatprep.subr.bf16.mxu1 %v3198_v17 }
 0x1ab   :  { %1224 = vmatpush1.bf16.msra.mxu0 %v3202_v18  ;;  %1265 = vmatpush1.bf16.msra.mxu1 %v3204_v19 }
 0x1ac   :  { %1225 = vmatprep.subr.bf16.mxu0 %v3208_v20  ;;  %1266 = vmatprep.subr.bf16.mxu1 %v3210_v21 }
 0x1af   :  { %1226 = vmatpush1.bf16.msra.mxu0 %v3214_v22  ;;  %1267 = vmatpush1.bf16.msra.mxu1 %v3216_v23 }
 0x1b0   :  { %1227 = vmatprep.subr.bf16.mxu0 %v3220_v24  ;;  %1268 = vmatprep.subr.bf16.mxu1 %v3222_v25 }
 0x1b3   :  { %1228 = vmatpush1.bf16.msra.mxu0 %v3226_v26  ;;  %1269 = vmatpush1.bf16.msra.mxu1 %v3228_v27 }
 0x1b4   :  { %1229 = vmatprep.subr.bf16.mxu0 %v3232_v28  ;;  %1270 = vmatprep.subr.bf16.mxu1 %v3234_v29 }
 0x1b7   :  { %1230 = vmatpush1.bf16.msra.mxu0 %v3238_v30  ;;  %1271 = vmatpush1.bf16.msra.mxu1 %v3240_v31 }
 0x1b8   :  { %1231 = vmatprep.subr.bf16.mxu0 %v3244_v32  ;;  %1272 = vmatprep.subr.bf16.mxu1 %v3246_v33 }
 0x1bb   :  { %1232 = vmatpush1.bf16.msra.mxu0 %v3250_v34  ;;  %1273 = vmatpush1.bf16.msra.mxu1 %v3252_v35 }
 0x1bc   :  { %1393 = vmatprep.subr.bf16.mxu0 %v3157_v3  ;;  %1434 = vmatprep.subr.bf16.mxu1 %v3159_v4 }
 0x271   :  { %v1075_v59 = vpop.f32.mrb[8].mxu0  ;;  %v1116_v60 = vpop.f32.mrb[8].mxu1 }
 0x272   :  { %v1077_v61 = vpop.f32.mrb[9].mxu0  ;;  %v1118_v62 = vpop.f32.mrb[9].mxu1 }
 0x273   :  { %v1127_v63 = vcombine.low %v1075_v59, %v1077_v61  ;;  %v1128_v1 = vcombine.low %v1116_v60, %v1118_v62  ;;  %v1079_v2 = vpop.f32.mrb[10].mxu0  ;;  %v1120_v36 = vpop.f32.mrb[10].mxu1 }
 0x274   :  { %v1080_v38 = vpop.f32.mrb[11].mxu0  ;;  %v1121_v39 = vpop.f32.mrb[11].mxu1 }
 0x275   :  { %v1135_v40 = vrot.slane %v1127_v63, %v3299_v5  ;;  %v1142_v41 = vrot.slane %v1128_v1, %v3299_v5 }
 0x277   :  { %v1143_v42 = vcombine.low %v1135_v40, %v1142_v41  ;;  %v1144_v43 = vcombine.high %v1135_v40, %v1142_v41 }
 0x279   :  { %v1151_v44 = vrot.slane %v1143_v42, %v3299_v5  ;;  %v1158_v46 = vrot.slane %v1144_v43, %v3299_v5 }
 0x27b   :  { %v1161_v50 = vadd.f32 %v1151_v44, %v1027_v48  ;;  %v1162_v51 = vadd.f32 %v1158_v46, %v1029_v49 }
 0x27d   :  { %v2488_v37 = vmul.f32 -1.442695, %v1161_v50  ;;  %v2489_v52 = vmul.f32 -1.442695, %v1162_v51  ;;  %v1177_v56 = vrot.slane %v1161_v50, 3  ;;  %v1178_v58 = vrot.slane %v1162_v51, 3 }
 0x27f   :  { %2759 = vpow2.f32 %v2488_v37 }
 0x280   :  { %2761 = vpow2.f32 %v2489_v52 }
 0x289   :  { %v2760_v53 = vpop.eup %2759 }
 0x28a   :  { %v2762_v54 = vpop.eup %2761  ;;  %v1169_v55 = vadd.f32 1.0, %v2760_v53 }
 0x28b   :  { %v1170_v57 = vadd.f32 1.0, %v2762_v54 }
 0x28c   :  { %2763 = vrcp.f32 %v1169_v55 }
 0x28d   :  { %2765 = vrcp.f32 %v1170_v57 }
 0x28e   :  { %2767 = vtanh.f32 %v1177_v56 }
 0x28f   :  { %2769 = vtanh.f32 %v1178_v58 }
 0x296   :  { %v2764_v59 = vpop.eup %2763 }
 0x297   :  { %v2766_v60 = vpop.eup %2765  ;;  %v1185_v61 = vrot.slane %v2764_v59, 1  ;;  %v1197_v42 = vrot.slane %v2764_v59, 2 }
 0x298   :  { %v2768_v62 = vpop.eup %2767  ;;  %v1186_v63 = vrot.slane %v2766_v60, 1  ;;  %v1198_v44 = vrot.slane %v2766_v60, 2 }
 0x299   :  { %v2770_v1 = vpop.eup %2769  ;;  %v1189_v2 = vmul.f32 %v1185_v61, %v3305_v47  ;;  %v1191_v36 = vmul.f32 %v2768_v62, %v2764_v59 }
 0x29a   :  { %v1190_v38 = vmul.f32 %v1186_v63, %v3307_v45  ;;  %v1192_v39 = vmul.f32 %v2770_v1, %v2766_v60 }
 0x29b   :  { %v3352_v40 = vadd.f32 %v1191_v36, %v1189_v2 }
 0x29c   :  { %v3354_v41 = vadd.f32 %v1192_v39, %v1190_v38 }
 0x29d   :  { %2771 = vtanh.f32 %v3352_v40 }
 0x29e   :  { %2773 = vtanh.f32 %v3354_v41 }
 0x2a7   :  { %v2772_v43 = vpop.eup %2771 }
 0x2a8   :  { %v2774_v46 = vpop.eup %2773  ;;  %v1201_v48 = vmul.f32 %v2772_v43, %v1197_v42  ;;  %v1204_v43 = vld [vmem:[#allocation2 + $0x2] ss:$8 sm:$0xf] }
 0x2a9   :  { %v1202_v49 = vmul.f32 %v2774_v46, %v1198_v44  ;;  %v1206_v44 = vld [vmem:[#allocation2 + $0x22] ss:$8 sm:$0xf] }
 0x2aa   :  { %v1207_v50 = vpack.c.bf16 %v1201_v48, %v1201_v48 }
 0x2ab   :  { %v1208_v47 = vpack.c.bf16 %v1202_v49, %v1202_v49 }
 0x2ac   :  { %v1211_v37 = vunpack.c.l.b16 %v1207_v50 }
 0x2ad   :  { %v1212_v51 = vunpack.c.l.b16 %v1208_v47 }
 0x2af   :  { %v1213_v45 = vrot.slane %v1212_v51, 7 }
 0x2b1   :  { %v1214_v52 = vsel %vm1037_vm0, %v1213_v45, %v1211_v37 }
 0x2b2   :  { %v1215_v53 = vpack.c.b16 %v1214_v52, %v1214_v52 }
 0x2b4   :  { %1250 = vmatmul.mubr.bf16.vlgmr.msra.gmra.mrb[12].mxu0 %v1215_v53  ;;  %1291 = vmatmul.mubr.bf16.vlgmr.msra.gmra.mrb[12].mxu1 %v1215_v53 }
 0x2b5   :  { %1394 = vmatpush1.bf16.msra.mxu0 %v3164_v6  ;;  %1435 = vmatpush1.bf16.msra.mxu1 %v3166_v7 }
 0x2b6   :  { %1395 = vmatprep.subr.bf16.mxu0 %v3170_v8  ;;  %1436 = vmatprep.subr.bf16.mxu1 %v3172_v9 }
 0x2b7   :  { %1425 = vmatprep.mubr.bf16.mxu0 %v2979_v0  ;;  %1466 = vmatprep.mubr.bf16.mxu1 %v2979_v0 }
 0x2b9   :  { %1396 = vmatpush1.bf16.msra.mxu0 %v3176_v10  ;;  %1437 = vmatpush1.bf16.msra.mxu1 %v3178_v11 }
 0x2ba   :  { %1397 = vmatprep.subr.bf16.mxu0 %v3182_v12  ;;  %1438 = vmatprep.subr.bf16.mxu1 %v3184_v13 }
 0x2bd   :  { %1398 = vmatpush1.bf16.msra.mxu0 %v3190_v14  ;;  %1439 = vmatpush1.bf16.msra.mxu1 %v3192_v15 }
 0x2be   :  { %1399 = vmatprep.subr.bf16.mxu0 %v3196_v16  ;;  %1440 = vmatprep.subr.bf16.mxu1 %v3198_v17 }
 0x2c1   :  { %1400 = vmatpush1.bf16.msra.mxu0 %v3202_v18  ;;  %1441 = vmatpush1.bf16.msra.mxu1 %v3204_v19 }
 0x2c2   :  { %1401 = vmatprep.subr.bf16.mxu0 %v3208_v20  ;;  %1442 = vmatprep.subr.bf16.mxu1 %v3210_v21 }
 0x2c5   :  { %1402 = vmatpush1.bf16.msra.mxu0 %v3214_v22  ;;  %1443 = vmatpush1.bf16.msra.mxu1 %v3216_v23 }
 0x2c6   :  { %1403 = vmatprep.subr.bf16.mxu0 %v3220_v24  ;;  %1444 = vmatprep.subr.bf16.mxu1 %v3222_v25 }
 0x2c9   :  { %1404 = vmatpush1.bf16.msra.mxu0 %v3226_v26  ;;  %1445 = vmatpush1.bf16.msra.mxu1 %v3228_v27 }
 0x2ca   :  { %1405 = vmatprep.subr.bf16.mxu0 %v3232_v28  ;;  %1446 = vmatprep.subr.bf16.mxu1 %v3234_v29 }
 0x2cd   :  { %1406 = vmatpush1.bf16.msra.mxu0 %v3238_v30  ;;  %1447 = vmatpush1.bf16.msra.mxu1 %v3240_v31 }
 0x2ce   :  { %1407 = vmatprep.subr.bf16.mxu0 %v3244_v32  ;;  %1448 = vmatprep.subr.bf16.mxu1 %v3246_v33 }
 0x2d1   :  { %1408 = vmatpush1.bf16.msra.mxu0 %v3250_v34  ;;  %1449 = vmatpush1.bf16.msra.mxu1 %v3252_v35 }
 0x2d2   :  { %1569 = vmatprep.subr.bf16.mxu0 %v3157_v3  ;;  %1610 = vmatprep.subr.bf16.mxu1 %v3159_v4 }
 0x387   :  { %v1251_v54 = vpop.f32.mrb[12].mxu0  ;;  %v1292_v55 = vpop.f32.mrb[12].mxu1 }
 0x388   :  { %v1253_v56 = vpop.f32.mrb[13].mxu0  ;;  %v1294_v57 = vpop.f32.mrb[13].mxu1 }
 0x389   :  { %v1303_v58 = vcombine.low %v1251_v54, %v1253_v56  ;;  %v1304_v59 = vcombine.low %v1292_v55, %v1294_v57  ;;  %v1255_v60 = vpop.f32.mrb[14].mxu0  ;;  %v1296_v61 = vpop.f32.mrb[14].mxu1 }
 0x38a   :  { %v1256_v62 = vpop.f32.mrb[15].mxu0  ;;  %v1297_v63 = vpop.f32.mrb[15].mxu1 }
 0x38b   :  { %v1311_v1 = vrot.slane %v1303_v58, %v3299_v5  ;;  %v1318_v2 = vrot.slane %v1304_v59, %v3299_v5 }
 0x38d   :  { %v1319_v36 = vcombine.low %v1311_v1, %v1318_v2  ;;  %v1320_v38 = vcombine.high %v1311_v1, %v1318_v2 }
 0x38f   :  { %v1327_v39 = vrot.slane %v1319_v36, %v3299_v5  ;;  %v1334_v42 = vrot.slane %v1320_v38, %v3299_v5 }
 0x391   :  { %v1337_v46 = vadd.f32 %v1327_v39, %v1204_v43  ;;  %v1338_v48 = vadd.f32 %v1334_v42, %v1206_v44 }
 0x393   :  { %v2490_v49 = vmul.f32 -1.442695, %v1337_v46  ;;  %v2491_v50 = vmul.f32 -1.442695, %v1338_v48  ;;  %v1353_v45 = vrot.slane %v1337_v46, 3  ;;  %v1354_v53 = vrot.slane %v1338_v48, 3 }
 0x395   :  { %2775 = vpow2.f32 %v2490_v49 }
 0x396   :  { %2777 = vpow2.f32 %v2491_v50 }
 0x39f   :  { %v2776_v47 = vpop.eup %2775 }
 0x3a0   :  { %v2778_v51 = vpop.eup %2777  ;;  %v1345_v37 = vadd.f32 1.0, %v2776_v47 }
 0x3a1   :  { %v1346_v52 = vadd.f32 1.0, %v2778_v51 }
 0x3a2   :  { %2779 = vrcp.f32 %v1345_v37 }
 0x3a3   :  { %2781 = vrcp.f32 %v1346_v52 }
 0x3a4   :  { %2783 = vtanh.f32 %v1353_v45 }
 0x3a5   :  { %2785 = vtanh.f32 %v1354_v53 }
 0x3ac   :  { %v2780_v54 = vpop.eup %2779 }
 0x3ad   :  { %v2782_v55 = vpop.eup %2781  ;;  %v1361_v56 = vrot.slane %v2780_v54, 1  ;;  %v1373_v36 = vrot.slane %v2780_v54, 2 }
 0x3ae   :  { %v2784_v57 = vpop.eup %2783  ;;  %v1362_v58 = vrot.slane %v2782_v55, 1  ;;  %v1374_v39 = vrot.slane %v2782_v55, 2 }
 0x3af   :  { %v2786_v59 = vpop.eup %2785  ;;  %v1365_v60 = vmul.f32 %v1361_v56, %v3352_v40  ;;  %v1367_v61 = vmul.f32 %v2784_v57, %v2780_v54 }
 0x3b0   :  { %v1366_v62 = vmul.f32 %v1362_v58, %v3354_v41  ;;  %v1368_v63 = vmul.f32 %v2786_v59, %v2782_v55 }
 0x3b1   :  { %v3399_v1 = vadd.f32 %v1367_v61, %v1365_v60 }
 0x3b2   :  { %v3401_v2 = vadd.f32 %v1368_v63, %v1366_v62  ;;  %v1380_v63 = vld [vmem:[#allocation2 + $0x3] ss:$8 sm:$0xf] }
 0x3b3   :  { %2787 = vtanh.f32 %v3399_v1 }
 0x3b4   :  { %2789 = vtanh.f32 %v3401_v2 }
 0x3bd   :  { %v2788_v38 = vpop.eup %2787 }
 0x3be   :  { %v2790_v42 = vpop.eup %2789  ;;  %v1377_v43 = vmul.f32 %v2788_v38, %v1373_v36  ;;  %v1382_v36 = vld [vmem:[#allocation2 + $0x23] ss:$8 sm:$0xf] }
 0x3bf   :  { %v1378_v44 = vmul.f32 %v2790_v42, %v1374_v39 }
 0x3c0   :  { %v1383_v46 = vpack.c.bf16 %v1377_v43, %v1377_v43 }
 0x3c1   :  { %v1384_v40 = vpack.c.bf16 %v1378_v44, %v1378_v44 }
 0x3c2   :  { %v1387_v49 = vunpack.c.l.b16 %v1383_v46 }
 0x3c3   :  { %v1388_v48 = vunpack.c.l.b16 %v1384_v40 }
 0x3c5   :  { %v1389_v41 = vrot.slane %v1388_v48, 7 }
 0x3c7   :  { %v1390_v50 = vsel %vm1037_vm0, %v1389_v41, %v1387_v49 }
 0x3c8   :  { %v1391_v47 = vpack.c.b16 %v1390_v50, %v1390_v50 }
 0x3ca   :  { %1426 = vmatmul.mubr.bf16.vlgmr.msra.gmra.mrb[16].mxu0 %v1391_v47  ;;  %1467 = vmatmul.mubr.bf16.vlgmr.msra.gmra.mrb[16].mxu1 %v1391_v47 }
 0x3cb   :  { %1570 = vmatpush1.bf16.msra.mxu0 %v3164_v6  ;;  %1611 = vmatpush1.bf16.msra.mxu1 %v3166_v7 }
 0x3cc   :  { %1571 = vmatprep.subr.bf16.mxu0 %v3170_v8  ;;  %1612 = vmatprep.subr.bf16.mxu1 %v3172_v9 }
 0x3cd   :  { %1601 = vmatprep.mubr.bf16.mxu0 %v2979_v0  ;;  %1642 = vmatprep.mubr.bf16.mxu1 %v2979_v0 }
 0x3cf   :  { %1572 = vmatpush1.bf16.msra.mxu0 %v3176_v10  ;;  %1613 = vmatpush1.bf16.msra.mxu1 %v3178_v11 }
 0x3d0   :  { %1573 = vmatprep.subr.bf16.mxu0 %v3182_v12  ;;  %1614 = vmatprep.subr.bf16.mxu1 %v3184_v13 }
 0x3d3   :  { %1574 = vmatpush1.bf16.msra.mxu0 %v3190_v14  ;;  %1615 = vmatpush1.bf16.msra.mxu1 %v3192_v15 }
 0x3d4   :  { %1575 = vmatprep.subr.bf16.mxu0 %v3196_v16  ;;  %1616 = vmatprep.subr.bf16.mxu1 %v3198_v17 }
 0x3d7   :  { %1576 = vmatpush1.bf16.msra.mxu0 %v3202_v18  ;;  %1617 = vmatpush1.bf16.msra.mxu1 %v3204_v19 }
 0x3d8   :  { %1577 = vmatprep.subr.bf16.mxu0 %v3208_v20  ;;  %1618 = vmatprep.subr.bf16.mxu1 %v3210_v21 }
 0x3db   :  { %1578 = vmatpush1.bf16.msra.mxu0 %v3214_v22  ;;  %1619 = vmatpush1.bf16.msra.mxu1 %v3216_v23 }
 0x3dc   :  { %1579 = vmatprep.subr.bf16.mxu0 %v3220_v24  ;;  %1620 = vmatprep.subr.bf16.mxu1 %v3222_v25 }
 0x3df   :  { %1580 = vmatpush1.bf16.msra.mxu0 %v3226_v26  ;;  %1621 = vmatpush1.bf16.msra.mxu1 %v3228_v27 }
 0x3e0   :  { %1581 = vmatprep.subr.bf16.mxu0 %v3232_v28  ;;  %1622 = vmatprep.subr.bf16.mxu1 %v3234_v29 }
 0x3e3   :  { %1582 = vmatpush1.bf16.msra.mxu0 %v3238_v30  ;;  %1623 = vmatpush1.bf16.msra.mxu1 %v3240_v31 }
 0x3e4   :  { %1583 = vmatprep.subr.bf16.mxu0 %v3244_v32  ;;  %1624 = vmatprep.subr.bf16.mxu1 %v3246_v33 }
 0x3e7   :  { %1584 = vmatpush1.bf16.msra.mxu0 %v3250_v34  ;;  %1625 = vmatpush1.bf16.msra.mxu1 %v3252_v35 }
 0x3e8   :  { %1745 = vmatprep.subr.bf16.mxu0 %v3157_v3  ;;  %1786 = vmatprep.subr.bf16.mxu1 %v3159_v4 }
 0x49d   :  { %v1427_v51 = vpop.f32.mrb[16].mxu0  ;;  %v1468_v37 = vpop.f32.mrb[16].mxu1 }
 0x49e   :  { %v1429_v45 = vpop.f32.mrb[17].mxu0  ;;  %v1470_v52 = vpop.f32.mrb[17].mxu1 }
 0x49f   :  { %v1479_v53 = vcombine.low %v1427_v51, %v1429_v45  ;;  %v1480_v54 = vcombine.low %v1468_v37, %v1470_v52  ;;  %v1431_v55 = vpop.f32.mrb[18].mxu0  ;;  %v1472_v56 = vpop.f32.mrb[18].mxu1 }
 0x4a0   :  { %v1432_v57 = vpop.f32.mrb[19].mxu0  ;;  %v1473_v58 = vpop.f32.mrb[19].mxu1 }
 0x4a1   :  { %v1487_v59 = vrot.slane %v1479_v53, %v3299_v5  ;;  %v1494_v60 = vrot.slane %v1480_v54, %v3299_v5 }
 0x4a3   :  { %v1495_v61 = vcombine.low %v1487_v59, %v1494_v60  ;;  %v1496_v62 = vcombine.high %v1487_v59, %v1494_v60 }
 0x4a5   :  { %v1503_v3 = vrot.slane %v1495_v61, %v3299_v5  ;;  %v1510_v4 = vrot.slane %v1496_v62, %v3299_v5 }
 0x4a7   :  { %v1513_v38 = vadd.f32 %v1503_v3, %v1380_v63  ;;  %v1514_v39 = vadd.f32 %v1510_v4, %v1382_v36 }
 0x4a9   :  { %v2492_v42 = vmul.f32 -1.442695, %v1513_v38  ;;  %v2493_v43 = vmul.f32 -1.442695, %v1514_v39  ;;  %v1529_v48 = vrot.slane %v1513_v38, 3  ;;  %v1530_v41 = vrot.slane %v1514_v39, 3 }
 0x4ab   :  { %2791 = vpow2.f32 %v2492_v42 }
 0x4ac   :  { %2793 = vpow2.f32 %v2493_v43 }
 0x4b5   :  { %v2792_v44 = vpop.eup %2791 }
 0x4b6   :  { %v2794_v46 = vpop.eup %2793  ;;  %v1521_v40 = vadd.f32 1.0, %v2792_v44 }
 0x4b7   :  { %v1522_v49 = vadd.f32 1.0, %v2794_v46 }
 0x4b8   :  { %2795 = vrcp.f32 %v1521_v40 }
 0x4b9   :  { %2797 = vrcp.f32 %v1522_v49 }
 0x4ba   :  { %2799 = vtanh.f32 %v1529_v48 }
 0x4bb   :  { %2801 = vtanh.f32 %v1530_v41 }
 0x4c2   :  { %v2796_v50 = vpop.eup %2795 }
 0x4c3   :  { %v2798_v47 = vpop.eup %2797  ;;  %v1537_v51 = vrot.slane %v2796_v50, 1  ;;  %v1549_v59 = vrot.slane %v2796_v50, 2 }
 0x4c4   :  { %v2800_v37 = vpop.eup %2799  ;;  %v1538_v45 = vrot.slane %v2798_v47, 1  ;;  %v1550_v61 = vrot.slane %v2798_v47, 2 }
 0x4c5   :  { %v2802_v52 = vpop.eup %2801  ;;  %v1541_v53 = vmul.f32 %v1537_v51, %v3399_v1  ;;  %v1543_v54 = vmul.f32 %v2800_v37, %v2796_v50 }
 0x4c6   :  { %v1542_v55 = vmul.f32 %v1538_v45, %v3401_v2  ;;  %v1544_v56 = vmul.f32 %v2802_v52, %v2798_v47 }
 0x4c7   :  { %v3446_v57 = vadd.f32 %v1543_v54, %v1541_v53 }
 0x4c8   :  { %v3448_v58 = vadd.f32 %v1544_v56, %v1542_v55 }
 0x4c9   :  { %2803 = vtanh.f32 %v3446_v57 }
 0x4ca   :  { %2805 = vtanh.f32 %v3448_v58 }
 0x4d3   :  { %v2804_v60 = vpop.eup %2803 }
 0x4d4   :  { %v2806_v62 = vpop.eup %2805  ;;  %v1553_v3 = vmul.f32 %v2804_v60, %v1549_v59 }
 0x4d5   :  { %v1554_v4 = vmul.f32 %v2806_v62, %v1550_v61 }
 0x4d6   :  { %v1559_v63 = vpack.c.bf16 %v1553_v3, %v1553_v3 }
 0x4d7   :  { %v1560_v1 = vpack.c.bf16 %v1554_v4, %v1554_v4 }
 0x4d8   :  { %v1563_v38 = vunpack.c.l.b16 %v1559_v63  ;;  %v3504_v63 = vld [vmem:[#allocation6] ss:$16 sps:$4 sm:$0xff]  }
 0x4d9   :  { %v1564_v36 = vunpack.c.l.b16 %v1560_v1  ;;  %v3507_v1 = vld [vmem:[#allocation6 + $0x8] ss:$16 sps:$4 sm:$0xff]  }
 0x4db   :  { %v1565_v2 = vrot.slane %v1564_v36, 7  ;;  %v3510_v36 = vld [vmem:[#allocation6 + $0x24] ss:$16 sps:$4 sm:$0xff]  }
 0x4dd   :  { %v1566_v39 = vsel %vm1037_vm0, %v1565_v2, %v1563_v38  ;;  %v3513_v38 = vld [vmem:[#allocation6 + $0x2c] ss:$16 sps:$4 sm:$0xff]   ;;  %v3518_v2 = vld [vmem:[#allocation6 + $0x20] ss:$16 sps:$4 sm:$0xff]  }
 0x4de   :  { %v1567_v42 = vpack.c.b16 %v1566_v39, %v1566_v39  ;;  %v3521_v39 = vld [vmem:[#allocation6 + $0x28] ss:$16 sps:$4 sm:$0xff]  }
 0x4e0   :  { %1602 = vmatmul.mubr.bf16.vlgmr.msra.gmra.mrb[20].mxu0 %v1567_v42  ;;  %1643 = vmatmul.mubr.bf16.vlgmr.msra.gmra.mrb[20].mxu1 %v1567_v42  ;;  %v3524_v42 = vld [vmem:[#allocation6 + $0x44] ss:$16 sps:$4 sm:$0xff]  }
 0x4e1   :  { %1746 = vmatpush1.bf16.msra.mxu0 %v3164_v6  ;;  %1787 = vmatpush1.bf16.msra.mxu1 %v3166_v7  ;;  %v3485_v6 = vld [vmem:[#allocation6 + $0x4] ss:$16 sps:$4 sm:$0xff]   ;;  %v3488_v7 = vld [vmem:[#allocation6 + $0xc] ss:$16 sps:$4 sm:$0xff]  }
 0x4e2   :  { %1747 = vmatprep.subr.bf16.mxu0 %v3170_v8  ;;  %1788 = vmatprep.subr.bf16.mxu1 %v3172_v9 }
 0x4e3   :  { %1777 = vmatprep.mubr.bf16.mxu0 %v2979_v0  ;;  %1818 = vmatprep.mubr.bf16.mxu1 %v2979_v0 }
 0x4e5   :  { %1748 = vmatpush1.bf16.msra.mxu0 %v3176_v10  ;;  %1789 = vmatpush1.bf16.msra.mxu1 %v3178_v11 }
 0x4e6   :  { %1749 = vmatprep.subr.bf16.mxu0 %v3182_v12  ;;  %1790 = vmatprep.subr.bf16.mxu1 %v3184_v13 }
 0x4e9   :  { %1750 = vmatpush1.bf16.msra.mxu0 %v3190_v14  ;;  %1791 = vmatpush1.bf16.msra.mxu1 %v3192_v15 }
 0x4ea   :  { %1751 = vmatprep.subr.bf16.mxu0 %v3196_v16  ;;  %1792 = vmatprep.subr.bf16.mxu1 %v3198_v17 }
 0x4ed   :  { %1752 = vmatpush1.bf16.msra.mxu0 %v3202_v18  ;;  %1793 = vmatpush1.bf16.msra.mxu1 %v3204_v19 }
 0x4ee   :  { %1753 = vmatprep.subr.bf16.mxu0 %v3208_v20  ;;  %1794 = vmatprep.subr.bf16.mxu1 %v3210_v21 }
 0x4f1   :  { %1754 = vmatpush1.bf16.msra.mxu0 %v3214_v22  ;;  %1795 = vmatpush1.bf16.msra.mxu1 %v3216_v23 }
 0x4f2   :  { %1755 = vmatprep.subr.bf16.mxu0 %v3220_v24  ;;  %1796 = vmatprep.subr.bf16.mxu1 %v3222_v25  ;;  %v1556_v24 = vld [vmem:[#allocation2 + $0x4] ss:$8 sm:$0xf] }
 0x4f3   :  { %v1558_v25 = vld [vmem:[#allocation2 + $0x24] ss:$8 sm:$0xf] }
 0x4f5   :  { %1756 = vmatpush1.bf16.msra.mxu0 %v3226_v26  ;;  %1797 = vmatpush1.bf16.msra.mxu1 %v3228_v27 }
 0x4f6   :  { %1757 = vmatprep.subr.bf16.mxu0 %v3232_v28  ;;  %1798 = vmatprep.subr.bf16.mxu1 %v3234_v29 }
 0x4f9   :  { %1758 = vmatpush1.bf16.msra.mxu0 %v3238_v30  ;;  %1799 = vmatpush1.bf16.msra.mxu1 %v3240_v31 }
 0x4fa   :  { %1759 = vmatprep.subr.bf16.mxu0 %v3244_v32  ;;  %1800 = vmatprep.subr.bf16.mxu1 %v3246_v33 }
 0x4fd   :  { %1760 = vmatpush1.bf16.msra.mxu0 %v3250_v34  ;;  %1801 = vmatpush1.bf16.msra.mxu1 %v3252_v35 }
 0x4fe   :  { %1921 = vmatprep.subr.bf16.mxu0 %v3485_v6  ;;  %1962 = vmatprep.subr.bf16.mxu1 %v3488_v7 }
 0x5b3   :  { %v1603_v8 = vpop.f32.mrb[20].mxu0  ;;  %v1644_v9 = vpop.f32.mrb[20].mxu1 }
 0x5b4   :  { %v1605_v10 = vpop.f32.mrb[21].mxu0  ;;  %v1646_v11 = vpop.f32.mrb[21].mxu1 }
 0x5b5   :  { %v1655_v12 = vcombine.low %v1603_v8, %v1605_v10  ;;  %v1656_v13 = vcombine.low %v1644_v9, %v1646_v11  ;;  %v1607_v14 = vpop.f32.mrb[22].mxu0  ;;  %v1648_v15 = vpop.f32.mrb[22].mxu1  ;;  %v3527_v8 = vld [vmem:[#allocation6 + $0x4c] ss:$16 sps:$4 sm:$0xff]   ;;  %v3530_v9 = vld [vmem:[#allocation6 + $0x40] ss:$16 sps:$4 sm:$0xff]  }
 0x5b6   :  { %v1608_v16 = vpop.f32.mrb[23].mxu0  ;;  %v1649_v17 = vpop.f32.mrb[23].mxu1  ;;  %v3533_v10 = vld [vmem:[#allocation6 + $0x48] ss:$16 sps:$4 sm:$0xff]   ;;  %v3536_v11 = vld [vmem:[#allocation6 + $0x64] ss:$16 sps:$4 sm:$0xff]  }
 0x5b7   :  { %v1663_v18 = vrot.slane %v1655_v12, %v3299_v5  ;;  %v1670_v19 = vrot.slane %v1656_v13, %v3299_v5  ;;  %v3539_v12 = vld [vmem:[#allocation6 + $0x6c] ss:$16 sps:$4 sm:$0xff]   ;;  %v3542_v13 = vld [vmem:[#allocation6 + $0x60] ss:$16 sps:$4 sm:$0xff]   ;;  %v3545_v14 = vld [vmem:[#allocation6 + $0x68] ss:$16 sps:$4 sm:$0xff]  }
 0x5b8   :  { %v3548_v15 = vld [vmem:[#allocation6 + $0x84] ss:$16 sps:$4 sm:$0xff]   ;;  %v3551_v16 = vld [vmem:[#allocation6 + $0x8c] ss:$16 sps:$4 sm:$0xff]   ;;  %v3554_v17 = vld [vmem:[#allocation6 + $0x80] ss:$16 sps:$4 sm:$0xff]  }
 0x5b9   :  { %v1671_v20 = vcombine.low %v1663_v18, %v1670_v19  ;;  %v1672_v21 = vcombine.high %v1663_v18, %v1670_v19  ;;  %v3557_v18 = vld [vmem:[#allocation6 + $0x88] ss:$16 sps:$4 sm:$0xff]   ;;  %v3560_v19 = vld [vmem:[#allocation6 + $0xa4] ss:$16 sps:$4 sm:$0xff]  }
 0x5bb   :  { %v1679_v22 = vrot.slane %v1671_v20, %v3299_v5  ;;  %v1686_v23 = vrot.slane %v1672_v21, %v3299_v5  ;;  %v3563_v20 = vld [vmem:[#allocation6 + $0xac] ss:$16 sps:$4 sm:$0xff]   ;;  %v3566_v21 = vld [vmem:[#allocation6 + $0xa0] ss:$16 sps:$4 sm:$0xff]  }
 0x5bd   :  { %v1689_v26 = vadd.f32 %v1679_v22, %v1556_v24  ;;  %v1690_v27 = vadd.f32 %v1686_v23, %v1558_v25  ;;  %v3569_v22 = vld [vmem:[#allocation6 + $0xa8] ss:$16 sps:$4 sm:$0xff]   ;;  %v3572_v23 = vld [vmem:[#allocation6 + $0xc4] ss:$16 sps:$4 sm:$0xff]   ;;  %v3575_v24 = vld [vmem:[#allocation6 + $0xcc] ss:$16 sps:$4 sm:$0xff]  }
 0x5be   :  { %v3578_v25 = vld [vmem:[#allocation6 + $0xc0] ss:$16 sps:$4 sm:$0xff]  }
 0x5bf   :  { %v2494_v28 = vmul.f32 -1.442695, %v1689_v26  ;;  %v2495_v29 = vmul.f32 -1.442695, %v1690_v27  ;;  %v1705_v33 = vrot.slane %v1689_v26, 3  ;;  %v1706_v35 = vrot.slane %v1690_v27, 3 }
 0x5c0   :  { %v3581_v26 = vld [vmem:[#allocation6 + $0xc8] ss:$16 sps:$4 sm:$0xff]   ;;  %v3584_v27 = vld [vmem:[#allocation6 + $0xe4] ss:$16 sps:$4 sm:$0xff]  }
 0x5c1   :  { %2807 = vpow2.f32 %v2494_v28  ;;  %v3587_v28 = vld [vmem:[#allocation6 + $0xec] ss:$16 sps:$4 sm:$0xff]  }
 0x5c2   :  { %2809 = vpow2.f32 %v2495_v29  ;;  %v3590_v29 = vld [vmem:[#allocation6 + $0xe0] ss:$16 sps:$4 sm:$0xff]  }
 0x5cb   :  { %v2808_v30 = vpop.eup %2807 }
 0x5cc   :  { %v2810_v31 = vpop.eup %2809  ;;  %v1697_v32 = vadd.f32 1.0, %v2808_v30  ;;  %v3593_v30 = vld [vmem:[#allocation6 + $0xe8] ss:$16 sps:$4 sm:$0xff]  }
 0x5cd   :  { %v1698_v34 = vadd.f32 1.0, %v2810_v31 }
 0x5ce   :  { %2811 = vrcp.f32 %v1697_v32 }
 0x5cf   :  { %2813 = vrcp.f32 %v1698_v34 }
 0x5d0   :  { %2815 = vtanh.f32 %v1705_v33 }
 0x5d1   :  { %2817 = vtanh.f32 %v1706_v35 }
 0x5d8   :  { %v2812_v43 = vpop.eup %2811 }
 0x5d9   :  { %v2814_v44 = vpop.eup %2813  ;;  %v1713_v46 = vrot.slane %v2812_v43, 1  ;;  %v1725_v52 = vrot.slane %v2812_v43, 2 }
 0x5da   :  { %v2816_v40 = vpop.eup %2815  ;;  %v1714_v48 = vrot.slane %v2814_v44, 1  ;;  %v1726_v54 = vrot.slane %v2814_v44, 2 }
 0x5db   :  { %v2818_v49 = vpop.eup %2817  ;;  %v1717_v41 = vmul.f32 %v1713_v46, %v3446_v57  ;;  %v1719_v50 = vmul.f32 %v2816_v40, %v2812_v43 }
 0x5dc   :  { %v1718_v47 = vmul.f32 %v1714_v48, %v3448_v58  ;;  %v1720_v51 = vmul.f32 %v2818_v49, %v2814_v44 }
 0x5dd   :  { %v3497_v37 = vadd.f32 %v1719_v50, %v1717_v41 }
 0x5de   :  { %v3499_v45 = vadd.f32 %v1720_v51, %v1718_v47  ;;  %v1732_v51 = vld [vmem:[#allocation2 + $0x5] ss:$8 sm:$0xf] }
 0x5df   :  { %2819 = vtanh.f32 %v3497_v37 }
 0x5e0   :  { %2821 = vtanh.f32 %v3499_v45 }
 0x5e9   :  { %v2820_v53 = vpop.eup %2819 }
 0x5ea   :  { %v2822_v55 = vpop.eup %2821  ;;  %v1729_v56 = vmul.f32 %v2820_v53, %v1725_v52  ;;  %v1734_v52 = vld [vmem:[#allocation2 + $0x25] ss:$8 sm:$0xf] }
 0x5eb   :  { %v1730_v59 = vmul.f32 %v2822_v55, %v1726_v54 }
 0x5ec   :  { %v1735_v60 = vpack.c.bf16 %v1729_v56, %v1729_v56 }
 0x5ed   :  { %v1736_v57 = vpack.c.bf16 %v1730_v59, %v1730_v59 }
 0x5ee   :  { %v1739_v62 = vunpack.c.l.b16 %v1735_v60 }
 0x5ef   :  { %v1740_v61 = vunpack.c.l.b16 %v1736_v57 }
 0x5f1   :  { %v1741_v58 = vrot.slane %v1740_v61, 7 }
 0x5f3   :  { %v1742_v3 = vsel %vm1037_vm0, %v1741_v58, %v1739_v62 }
 0x5f4   :  { %v1743_v4 = vpack.c.b16 %v1742_v3, %v1742_v3 }
 0x5f6   :  { %1778 = vmatmul.mubr.bf16.vlgmr.msra.gmra.mrb[24].mxu0 %v1743_v4  ;;  %1819 = vmatmul.mubr.bf16.vlgmr.msra.gmra.mrb[24].mxu1 %v1743_v4 }
 0x5f7   :  { %1922 = vmatpush1.bf16.msra.mxu0 %v3504_v63  ;;  %1963 = vmatpush1.bf16.msra.mxu1 %v3507_v1 }
 0x5f8   :  { %1923 = vmatprep.subr.bf16.mxu0 %v3510_v36  ;;  %1964 = vmatprep.subr.bf16.mxu1 %v3513_v38 }
 0x5f9   :  { %1953 = vmatprep.mubr.bf16.mxu0 %v2979_v0  ;;  %1994 = vmatprep.mubr.bf16.mxu1 %v2979_v0 }
 0x5fb   :  { %1924 = vmatpush1.bf16.msra.mxu0 %v3518_v2  ;;  %1965 = vmatpush1.bf16.msra.mxu1 %v3521_v39 }
 0x5fc   :  { %1925 = vmatprep.subr.bf16.mxu0 %v3524_v42  ;;  %1966 = vmatprep.subr.bf16.mxu1 %v3527_v8 }
 0x5ff   :  { %1926 = vmatpush1.bf16.msra.mxu0 %v3530_v9  ;;  %1967 = vmatpush1.bf16.msra.mxu1 %v3533_v10 }
 0x600   :  { %1927 = vmatprep.subr.bf16.mxu0 %v3536_v11  ;;  %1968 = vmatprep.subr.bf16.mxu1 %v3539_v12 }
 0x603   :  { %1928 = vmatpush1.bf16.msra.mxu0 %v3542_v13  ;;  %1969 = vmatpush1.bf16.msra.mxu1 %v3545_v14 }
 0x604   :  { %1929 = vmatprep.subr.bf16.mxu0 %v3548_v15  ;;  %1970 = vmatprep.subr.bf16.mxu1 %v3551_v16 }
 0x607   :  { %1930 = vmatpush1.bf16.msra.mxu0 %v3554_v17  ;;  %1971 = vmatpush1.bf16.msra.mxu1 %v3557_v18 }
 0x608   :  { %1931 = vmatprep.subr.bf16.mxu0 %v3560_v19  ;;  %1972 = vmatprep.subr.bf16.mxu1 %v3563_v20 }
 0x60b   :  { %1932 = vmatpush1.bf16.msra.mxu0 %v3566_v21  ;;  %1973 = vmatpush1.bf16.msra.mxu1 %v3569_v22 }
 0x60c   :  { %1933 = vmatprep.subr.bf16.mxu0 %v3572_v23  ;;  %1974 = vmatprep.subr.bf16.mxu1 %v3575_v24 }
 0x60f   :  { %1934 = vmatpush1.bf16.msra.mxu0 %v3578_v25  ;;  %1975 = vmatpush1.bf16.msra.mxu1 %v3581_v26 }
 0x610   :  { %1935 = vmatprep.subr.bf16.mxu0 %v3584_v27  ;;  %1976 = vmatprep.subr.bf16.mxu1 %v3587_v28 }
 0x613   :  { %1936 = vmatpush1.bf16.msra.mxu0 %v3590_v29  ;;  %1977 = vmatpush1.bf16.msra.mxu1 %v3593_v30 }
 0x614   :  { %2097 = vmatprep.subr.bf16.mxu0 %v3485_v6  ;;  %2138 = vmatprep.subr.bf16.mxu1 %v3488_v7 }
 0x6c9   :  { %v1779_v31 = vpop.f32.mrb[24].mxu0  ;;  %v1820_v32 = vpop.f32.mrb[24].mxu1 }
 0x6ca   :  { %v1781_v33 = vpop.f32.mrb[25].mxu0  ;;  %v1822_v34 = vpop.f32.mrb[25].mxu1 }
 0x6cb   :  { %v1831_v35 = vcombine.low %v1779_v31, %v1781_v33  ;;  %v1832_v43 = vcombine.low %v1820_v32, %v1822_v34  ;;  %v1783_v44 = vpop.f32.mrb[26].mxu0  ;;  %v1824_v46 = vpop.f32.mrb[26].mxu1 }
 0x6cc   :  { %v1784_v40 = vpop.f32.mrb[27].mxu0  ;;  %v1825_v48 = vpop.f32.mrb[27].mxu1 }
 0x6cd   :  { %v1839_v49 = vrot.slane %v1831_v35, %v3299_v5  ;;  %v1846_v41 = vrot.slane %v1832_v43, %v3299_v5 }
 0x6cf   :  { %v1847_v50 = vcombine.low %v1839_v49, %v1846_v41  ;;  %v1848_v47 = vcombine.high %v1839_v49, %v1846_v41 }
 0x6d1   :  { %v1855_v6 = vrot.slane %v1847_v50, %v3299_v5  ;;  %v1862_v7 = vrot.slane %v1848_v47, %v3299_v5 }
 0x6d3   :  { %v1865_v53 = vadd.f32 %v1855_v6, %v1732_v51  ;;  %v1866_v54 = vadd.f32 %v1862_v7, %v1734_v52 }
 0x6d5   :  { %v2496_v55 = vmul.f32 -1.442695, %v1865_v53  ;;  %v2497_v56 = vmul.f32 -1.442695, %v1866_v54  ;;  %v1881_v61 = vrot.slane %v1865_v53, 3  ;;  %v1882_v58 = vrot.slane %v1866_v54, 3 }
 0x6d7   :  { %2823 = vpow2.f32 %v2496_v55 }
 0x6d8   :  { %2825 = vpow2.f32 %v2497_v56 }
 0x6e1   :  { %v2824_v59 = vpop.eup %2823 }
 0x6e2   :  { %v2826_v60 = vpop.eup %2825  ;;  %v1873_v57 = vadd.f32 1.0, %v2824_v59 }
 0x6e3   :  { %v1874_v62 = vadd.f32 1.0, %v2826_v60 }
 0x6e4   :  { %2827 = vrcp.f32 %v1873_v57 }
 0x6e5   :  { %2829 = vrcp.f32 %v1874_v62 }
 0x6e6   :  { %2831 = vtanh.f32 %v1881_v61 }
 0x6e7   :  { %2833 = vtanh.f32 %v1882_v58 }
 0x6ee   :  { %v2828_v3 = vpop.eup %2827 }
 0x6ef   :  { %v2830_v4 = vpop.eup %2829  ;;  %v1889_v31 = vrot.slane %v2828_v3, 1  ;;  %v1901_v49 = vrot.slane %v2828_v3, 2 }
 0x6f0   :  { %v2832_v32 = vpop.eup %2831  ;;  %v1890_v33 = vrot.slane %v2830_v4, 1  ;;  %v1902_v50 = vrot.slane %v2830_v4, 2 }
 0x6f1   :  { %v2834_v34 = vpop.eup %2833  ;;  %v1893_v35 = vmul.f32 %v1889_v31, %v3497_v37  ;;  %v1895_v43 = vmul.f32 %v2832_v32, %v2828_v3 }
 0x6f2   :  { %v1894_v44 = vmul.f32 %v1890_v33, %v3499_v45  ;;  %v1896_v46 = vmul.f32 %v2834_v34, %v2830_v4 }
 0x6f3   :  { %v3604_v40 = vadd.f32 %v1895_v43, %v1893_v35 }
 0x6f4   :  { %v3606_v48 = vadd.f32 %v1896_v46, %v1894_v44 }
 0x6f5   :  { %2835 = vtanh.f32 %v3604_v40 }
 0x6f6   :  { %2837 = vtanh.f32 %v3606_v48 }
 0x6ff   :  { %v2836_v41 = vpop.eup %2835 }
 0x700   :  { %v2838_v47 = vpop.eup %2837  ;;  %v1905_v6 = vmul.f32 %v2836_v41, %v1901_v49 }
 0x701   :  { %v1906_v7 = vmul.f32 %v2838_v47, %v1902_v50  ;;  %v2259_v47 = vld [vmem:[%s3733_s6] sm:$0xff] }
 0x702   :  { %v1911_v51 = vpack.c.bf16 %v1905_v6, %v1905_v6  ;;  %v2260_v6 = vld [vmem:[%s3733_s6 + $0x8] sm:$0xff] }
 0x703   :  { %v1912_v37 = vpack.c.bf16 %v1906_v7, %v1906_v7  ;;  %v2556_v7 = vpack.c.bf16 %v2260_v6, %v2259_v47 }
 0x704   :  { %v1915_v53 = vunpack.c.l.b16 %v1911_v51  ;;  %v2981_v51 = vmov 0.0|0.0  }
 0x705   :  { %v1916_v52 = vunpack.c.l.b16 %v1912_v37  ;;  %v2261_v37 = vld [vmem:[%s3733_s6 + $0x10] sm:$0xff] }
 0x707   :  { %v1917_v45 = vrot.slane %v1916_v52, 7  ;;  %v2262_v52 = vld [vmem:[%s3733_s6 + $0x18] sm:$0xff] }
 0x709   :  { %v1918_v54 = vsel %vm1037_vm0, %v1917_v45, %v1915_v53  ;;  %v2559_v53 = vpack.c.bf16 %v2262_v52, %v2261_v37  ;;  %v2263_v45 = vld [vmem:[%s3733_s6 + $0x20] sm:$0xff] }
 0x70a   :  { %v1919_v55 = vpack.c.b16 %v1918_v54, %v1918_v54  ;;  %v2264_v54 = vld [vmem:[%s3733_s6 + $0x28] sm:$0xff] }
 0x70c   :  { %1954 = vmatmul.mubr.bf16.vlgmr.msra.gmra.mrb[28].mxu0 %v1919_v55  ;;  %1995 = vmatmul.mubr.bf16.vlgmr.msra.gmra.mrb[28].mxu1 %v1919_v55  ;;  %v2562_v55 = vpack.c.bf16 %v2264_v54, %v2263_v45 }
 0x70d   :  { %2098 = vmatpush1.bf16.msra.mxu0 %v3504_v63  ;;  %2139 = vmatpush1.bf16.msra.mxu1 %v3507_v1 }
 0x70e   :  { %2099 = vmatprep.subr.bf16.mxu0 %v3510_v36  ;;  %2140 = vmatprep.subr.bf16.mxu1 %v3513_v38 }
 0x70f   :  { %2129 = vmatprep.mubr.bf16.mxu0 %v2979_v0  ;;  %2170 = vmatprep.mubr.bf16.mxu1 %v2979_v0 }
 0x711   :  { %2100 = vmatpush1.bf16.msra.mxu0 %v3518_v2  ;;  %2141 = vmatpush1.bf16.msra.mxu1 %v3521_v39 }
 0x712   :  { %2101 = vmatprep.subr.bf16.mxu0 %v3524_v42  ;;  %2142 = vmatprep.subr.bf16.mxu1 %v3527_v8 }
 0x715   :  { %2102 = vmatpush1.bf16.msra.mxu0 %v3530_v9  ;;  %2143 = vmatpush1.bf16.msra.mxu1 %v3533_v10 }
 0x716   :  { %2103 = vmatprep.subr.bf16.mxu0 %v3536_v11  ;;  %2144 = vmatprep.subr.bf16.mxu1 %v3539_v12 }
 0x719   :  { %2104 = vmatpush1.bf16.msra.mxu0 %v3542_v13  ;;  %2145 = vmatpush1.bf16.msra.mxu1 %v3545_v14 }
 0x71a   :  { %2105 = vmatprep.subr.bf16.mxu0 %v3548_v15  ;;  %2146 = vmatprep.subr.bf16.mxu1 %v3551_v16  ;;  %v1908_v16 = vld [vmem:[#allocation2 + $0x6] ss:$8 sm:$0xf] }
 0x71d   :  { %2106 = vmatpush1.bf16.msra.mxu0 %v3554_v17  ;;  %2147 = vmatpush1.bf16.msra.mxu1 %v3557_v18  ;;  %v1910_v17 = vld [vmem:[#allocation2 + $0x26] ss:$8 sm:$0xf] }
 0x71e   :  { %2107 = vmatprep.subr.bf16.mxu0 %v3560_v19  ;;  %2148 = vmatprep.subr.bf16.mxu1 %v3563_v20 }
 0x721   :  { %2108 = vmatpush1.bf16.msra.mxu0 %v3566_v21  ;;  %2149 = vmatpush1.bf16.msra.mxu1 %v3569_v22 }
 0x722   :  { %2109 = vmatprep.subr.bf16.mxu0 %v3572_v23  ;;  %2150 = vmatprep.subr.bf16.mxu1 %v3575_v24 }
 0x725   :  { %2110 = vmatpush1.bf16.msra.mxu0 %v3578_v25  ;;  %2151 = vmatpush1.bf16.msra.mxu1 %v3581_v26 }
 0x726   :  { %2111 = vmatprep.subr.bf16.mxu0 %v3584_v27  ;;  %2152 = vmatprep.subr.bf16.mxu1 %v3587_v28 }
 0x729   :  { %2112 = vmatpush1.bf16.msra.mxu0 %v3590_v29  ;;  %2153 = vmatpush1.bf16.msra.mxu1 %v3593_v30 }
 0x72a   :  { %2555 = vmatprep.subr.bf16.mxu0 %v2981_v51 }
 0x7df   :  { %v1955_v0 = vpop.f32.mrb[28].mxu0  ;;  %v1996_v63 = vpop.f32.mrb[28].mxu1 }
 0x7e0   :  { %v1957_v1 = vpop.f32.mrb[29].mxu0  ;;  %v1998_v36 = vpop.f32.mrb[29].mxu1 }
 0x7e1   :  { %v2007_v38 = vcombine.low %v1955_v0, %v1957_v1  ;;  %v2008_v2 = vcombine.low %v1996_v63, %v1998_v36  ;;  %v1959_v39 = vpop.f32.mrb[30].mxu0  ;;  %v2000_v42 = vpop.f32.mrb[30].mxu1  ;;  %v2265_v0 = vld [vmem:[%s3733_s6 + $0x30] sm:$0xff]  ;;  %v2266_v63 = vld [vmem:[%s3733_s6 + $0x38] sm:$0xff]  ;;  %v2267_v36 = vld [vmem:[%s3733_s6 + $0x40] sm:$0xff] }
 0x7e2   :  { %v1960_v8 = vpop.f32.mrb[31].mxu0  ;;  %v2001_v9 = vpop.f32.mrb[31].mxu1  ;;  %v2565_v1 = vpack.c.bf16 %v2266_v63, %v2265_v0  ;;  %v2269_v42 = vld [vmem:[%s3733_s6 + $0x50] sm:$0xff] }
 0x7e3   :  { %v2015_v10 = vrot.slane %v2007_v38, %v3299_v5  ;;  %v2022_v11 = vrot.slane %v2008_v2, %v3299_v5  ;;  %v2268_v38 = vld [vmem:[%s3733_s6 + $0x48] sm:$0xff]  ;;  %v2983_v2 = vmov 0.0   ;;  %v2270_v8 = vld [vmem:[%s3733_s6 + $0x58] sm:$0xff] }
 0x7e4   :  { %v2568_v39 = vpack.c.bf16 %v2268_v38, %v2267_v36  ;;  %v2571_v9 = vpack.c.bf16 %v2270_v8, %v2269_v42 }
 0x7e5   :  { %v2023_v12 = vcombine.low %v2015_v10, %v2022_v11  ;;  %v2024_v13 = vcombine.high %v2015_v10, %v2022_v11  ;;  %v2271_v10 = vld [vmem:[%s3733_s6 + $0x60] sm:$0xff]  ;;  %v2272_v11 = vld [vmem:[%s3733_s6 + $0x68] sm:$0xff] }
 0x7e7   :  { %v2031_v14 = vrot.slane %v2023_v12, %v3299_v5  ;;  %v2038_v15 = vrot.slane %v2024_v13, %v3299_v5  ;;  %v2574_v12 = vpack.c.bf16 %v2272_v11, %v2271_v10  ;;  %v2273_v13 = vld [vmem:[%s3733_s6 + $0x70] sm:$0xff] }
 0x7e9   :  { %v2041_v18 = vadd.f32 %v2031_v14, %v1908_v16  ;;  %v2042_v19 = vadd.f32 %v2038_v15, %v1910_v17  ;;  %v2274_v14 = vld [vmem:[%s3733_s6 + $0x78] sm:$0xff] }
 0x7ea   :  { %v2577_v15 = vpack.c.bf16 %v2274_v14, %v2273_v13 }
 0x7eb   :  { %v2498_v20 = vmul.f32 -1.442695, %v2041_v18  ;;  %v2499_v21 = vmul.f32 -1.442695, %v2042_v19  ;;  %v2057_v25 = vrot.slane %v2041_v18, 3  ;;  %v2058_v27 = vrot.slane %v2042_v19, 3 }
 0x7ed   :  { %2839 = vpow2.f32 %v2498_v20 }
 0x7ee   :  { %2841 = vpow2.f32 %v2499_v21 }
 0x7f7   :  { %v2840_v22 = vpop.eup %2839 }
 0x7f8   :  { %v2842_v23 = vpop.eup %2841  ;;  %v2049_v24 = vadd.f32 1.0, %v2840_v22 }
 0x7f9   :  { %v2050_v26 = vadd.f32 1.0, %v2842_v23 }
 0x7fa   :  { %2843 = vrcp.f32 %v2049_v24 }
 0x7fb   :  { %2845 = vrcp.f32 %v2050_v26 }
 0x7fc   :  { %2847 = vtanh.f32 %v2057_v25 }
 0x7fd   :  { %2849 = vtanh.f32 %v2058_v27 }
 0x804   :  { %v2844_v28 = vpop.eup %2843 }
 0x805   :  { %v2846_v29 = vpop.eup %2845  ;;  %v2065_v30 = vrot.slane %v2844_v28, 1  ;;  %v2077_v31 = vrot.slane %v2844_v28, 2 }
 0x806   :  { %v2848_v56 = vpop.eup %2847  ;;  %v2066_v59 = vrot.slane %v2846_v29, 1  ;;  %v2078_v33 = vrot.slane %v2846_v29, 2 }
 0x807   :  { %v2850_v60 = vpop.eup %2849  ;;  %v2069_v57 = vmul.f32 %v2065_v30, %v3604_v40  ;;  %v2071_v61 = vmul.f32 %v2848_v56, %v2844_v28 }
 0x808   :  { %v2070_v62 = vmul.f32 %v2066_v59, %v3606_v48  ;;  %v2072_v58 = vmul.f32 %v2850_v60, %v2846_v29  ;;  %v2084_v59 = vld [vmem:[#allocation2 + $0x7] ss:$8 sm:$0xf] }
 0x809   :  { %v3649_v3 = vadd.f32 %v2071_v61, %v2069_v57  ;;  %v2086_v60 = vld [vmem:[#allocation2 + $0x27] ss:$8 sm:$0xf] }
 0x80a   :  { %v3651_v4 = vadd.f32 %v2072_v58, %v2070_v62 }
 0x80b   :  { %2851 = vtanh.f32 %v3649_v3 }
 0x80c   :  { %2853 = vtanh.f32 %v3651_v4 }
 0x815   :  { %v2852_v32 = vpop.eup %2851 }
 0x816   :  { %v2854_v34 = vpop.eup %2853  ;;  %v2081_v35 = vmul.f32 %v2852_v32, %v2077_v31 }
 0x817   :  { %v2082_v43 = vmul.f32 %v2854_v34, %v2078_v33 }
 0x818   :  { %v2087_v44 = vpack.c.bf16 %v2081_v35, %v2081_v35 }
 0x819   :  { %v2088_v46 = vpack.c.bf16 %v2082_v43, %v2082_v43 }
 0x81a   :  { %v2091_v49 = vunpack.c.l.b16 %v2087_v44 }
 0x81b   :  { %v2092_v40 = vunpack.c.l.b16 %v2088_v46 }
 0x81d   :  { %v2093_v48 = vrot.slane %v2092_v40, 7 }
 0x81f   :  { %v2094_v41 = vsel %vm1037_vm0, %v2093_v48, %v2091_v49 }
 0x820   :  { %v2095_v50 = vpack.c.b16 %v2094_v41, %v2094_v41 }
 0x822   :  { %2130 = vmatmul.mubr.bf16.vlgmr.msra.gmra.mrb[32].mxu0 %v2095_v50  ;;  %2171 = vmatmul.mubr.bf16.vlgmr.msra.gmra.mrb[32].mxu1 %v2095_v50 }
 0x823   :  { %2557 = vmatpush3.bf16.msra.mxu0 %v2556_v7  ;;  %2552 = vmatprep.mubr.msk.f32.mxu0 %vm2982_vm1, %v2983_v2 }
 0x824   :  { %2558 = vmatprep.subr.bf16.mxu0 %v2981_v51 }
 0x827   :  { %2560 = vmatpush3.bf16.msra.mxu0 %v2559_v53 }
 0x828   :  { %2561 = vmatprep.subr.bf16.mxu0 %v2981_v51 }
 0x82b   :  { %2563 = vmatpush3.bf16.msra.mxu0 %v2562_v55 }
 0x82c   :  { %2564 = vmatprep.subr.bf16.mxu0 %v2981_v51 }
 0x82f   :  { %2566 = vmatpush3.bf16.msra.mxu0 %v2565_v1 }
 0x830   :  { %2567 = vmatprep.subr.bf16.mxu0 %v2981_v51 }
 0x833   :  { %2569 = vmatpush3.bf16.msra.mxu0 %v2568_v39 }
 0x834   :  { %2570 = vmatprep.subr.bf16.mxu0 %v2981_v51 }
 0x837   :  { %2572 = vmatpush3.bf16.msra.mxu0 %v2571_v9 }
 0x838   :  { %2573 = vmatprep.subr.bf16.mxu0 %v2981_v51 }
 0x83b   :  { %2575 = vmatpush3.bf16.msra.mxu0 %v2574_v12 }
 0x83c   :  { %2576 = vmatprep.subr.bf16.mxu0 %v2981_v51 }
 0x83f   :  { %2578 = vmatpush3.bf16.msra.mxu0 %v2577_v15 }
 0x8f5   :  { %v2131_v16 = vpop.f32.mrb[32].mxu0  ;;  %v2172_v17 = vpop.f32.mrb[32].mxu1 }
 0x8f6   :  { %v2133_v18 = vpop.f32.mrb[33].mxu0  ;;  %v2174_v19 = vpop.f32.mrb[33].mxu1 }
 0x8f7   :  { %v2183_v20 = vcombine.low %v2131_v16, %v2133_v18  ;;  %v2184_v21 = vcombine.low %v2172_v17, %v2174_v19  ;;  %v2135_v22 = vpop.f32.mrb[34].mxu0  ;;  %v2176_v23 = vpop.f32.mrb[34].mxu1 }
 0x8f8   :  { %v2136_v24 = vpop.f32.mrb[35].mxu0  ;;  %v2177_v25 = vpop.f32.mrb[35].mxu1 }
 0x8f9   :  { %v2191_v26 = vrot.slane %v2183_v20, %v3299_v5  ;;  %v2198_v27 = vrot.slane %v2184_v21, %v3299_v5 }
 0x8fb   :  { %v2199_v28 = vcombine.low %v2191_v26, %v2198_v27  ;;  %v2200_v29 = vcombine.high %v2191_v26, %v2198_v27 }
 0x8fd   :  { %v2207_v30 = vrot.slane %v2199_v28, %v3299_v5  ;;  %v2214_v56 = vrot.slane %v2200_v29, %v3299_v5 }
 0x8ff   :  { %v2217_v57 = vadd.f32 %v2207_v30, %v2084_v59  ;;  %v2218_v61 = vadd.f32 %v2214_v56, %v2086_v60 }
 0x901   :  { %v2500_v62 = vmul.f32 -1.442695, %v2217_v57  ;;  %v2501_v58 = vmul.f32 -1.442695, %v2218_v61  ;;  %v2233_v34 = vrot.slane %v2217_v57, 3  ;;  %v2234_v43 = vrot.slane %v2218_v61, 3 }
 0x903   :  { %2855 = vpow2.f32 %v2500_v62 }
 0x904   :  { %2857 = vpow2.f32 %v2501_v58 }
 0x90d   :  { %v2856_v31 = vpop.eup %2855 }
 0x90e   :  { %v2858_v32 = vpop.eup %2857  ;;  %v2225_v33 = vadd.f32 1.0, %v2856_v31 }
 0x90f   :  { %v2226_v35 = vadd.f32 1.0, %v2858_v32 }
 0x910   :  { %2859 = vrcp.f32 %v2225_v33 }
 0x911   :  { %2861 = vrcp.f32 %v2226_v35 }
 0x912   :  { %2863 = vtanh.f32 %v2233_v34 }
 0x913   :  { %2865 = vtanh.f32 %v2234_v43 }
 0x91a   :  { %v2860_v44 = vpop.eup %2859 }
 0x91b   :  { %v2862_v46 = vpop.eup %2861  ;;  %v2241_v40 = vrot.slane %v2860_v44, 1  ;;  %v2253_v52 = vrot.slane %v2860_v44, 2 }
 0x91c   :  { %v2864_v49 = vpop.eup %2863  ;;  %v2242_v48 = vrot.slane %v2862_v46, 1  ;;  %v2254_v45 = vrot.slane %v2862_v46, 2 }
 0x91d   :  { %v2866_v41 = vpop.eup %2865  ;;  %v2245_v50 = vmul.f32 %v2241_v40, %v3649_v3  ;;  %v2247_v47 = vmul.f32 %v2864_v49, %v2860_v44  ;;  %v2502_v3 = vld [vmem:[%s3734_s7] ss:$0 sm:$0xff] }
 0x91e   :  { %v2246_v6 = vmul.f32 %v2242_v48, %v3651_v4  ;;  %v2248_v7 = vmul.f32 %v2866_v41, %v2862_v46 }
 0x91f   :  { %v2249_v51 = vadd.f32 %v2247_v47, %v2245_v50 }
 0x920   :  { %v2250_v37 = vadd.f32 %v2248_v7, %v2246_v6 }
 0x921   :  { %2867 = vtanh.f32 %v2249_v51 }
 0x922   :  { %2869 = vtanh.f32 %v2250_v37 }
 0x92b   :  { %v2868_v53 = vpop.eup %2867 }
 0x92c   :  { %v2870_v54 = vpop.eup %2869  ;;  %v2257_v55 = vmul.f32 %v2868_v53, %v2253_v52 }
 0x92d   :  { %v2258_v0 = vmul.f32 %v2870_v54, %v2254_v45 }
 0x92f   :  { %v2284_v63 = vcombine.low %v2257_v55, %v2258_v0 }
 0x931   :  { %v2291_v1 = vrot.slane %v2284_v63, %v3299_v5 }
 0x933   :  { %v2298_v36 = vrot.slane %v2291_v1, %v3299_v5 }
 0x935   :  { %2553 = vmatmul.mubr.f32.vlgmr.msra.gmra.mrb[36].mxu0 %v2298_v36 }
 0xa08   :  { %v2366_v4 = vpop.f32.mrb[36].mxu0 }
 0xa09   :  { %v2367_v38 = vadd.f32 %v2502_v3, %v2366_v4  ;;  %v2554_v2 = vpop.f32.mrb[37].mxu0 }
 0xa0b   :  { %2371 = vst.msk [vmem:[#allocation8] sm:$0x3] %vm2370_vm2, %v2367_v38 }
 0xa0c   :  { %2958 = shalt.err (!%p2955_p6)
}
 0xa0d   :  { %s2959_s9 = scalar_lea.hbm %s3735_s8, 32 }
 0xa0e   :  { %p2960_p7 = scmp.ne.s32.totalorder %s3735_s8, %s2959_s9  ;;  %p2963_p8 = scmp.lt.u32.totalorder %s2959_s9, %s3735_s8 }
 0xa10   :  { %p2965_p9 = pnand %p2963_p8, %p2960_p7 }
 0xa12   :  { %2968 = shalt.err (!%p2965_p9)
}
 0xa13   :  { %2381 = dma.vmem_to_hbm [thread:$0]  %s2379_s3, 32, %s3735_s8, [#allocation5]  }
 0xa14   :  { %2973 = dma.done.wait [#allocation5], 32  }
 0xa15   :  { %2974 = vsyncadd [#allocation5], 4294967264 }
 0xa16   :  { %2385 = vsyncpa [#allocation4], 1 }
 0xa17   :  { %2386 = vsyncpa [#allocation7], 1 }
 0xa18   :  { %2387 = vsyncpa [#allocation5], 1 }

</bundles_post_ra>
